<compile_context>
chip_gen: v7x
topology: tpu7x:2x2x1
jax: 0.10.0
libtpu: 0.0.40
codegen_flags: <defaults>
</compile_context>

<pallas_src>
import functools

import jax
import jax.numpy as jnp
from jax.experimental import pallas as pl
from jax.experimental.pallas import tpu as pltpu

VMEM = pltpu.MemorySpace.VMEM
_VMEM_LIMIT = 48 * 1024 * 1024   # leaves headroom under v7x's 64 MiB physical VMEM


# ---------------------------------------------------------------------------
# Kernel A: fused encoder -> decoder -> g_ws/g_sw (alpha, beta) -> classifier,
# one grid step per batch element (all intermediates stay in VMEM).
# ---------------------------------------------------------------------------
def crn_main_kernel(
    # data (per-batch blocks)
    x_w_ref, x_s_ref, d_w_ref, d_s_ref,
    # encoder_w / encoder_s
    ew_w1, ew_b1, ew_w2, ew_b2,
    es_w1, es_b1, es_w2, es_b2,
    # decoder_w / decoder_s
    dw_w1, dw_b1, dw_w2, dw_b2,
    dsd_w1, dsd_b1, dsd_w2, dsd_b2,
    # g_ws: split W1 (alpha split at Dw, beta split at L), plus b1/W2/b2
    gws_w1_d, gws_w1_x, gws_w1_a, gws_w1_b, gws_b1, gws_w2, gws_b2,
    # g_sw: split W1 (alpha split at Ds, beta split at L), plus b1/W2/b2
    gsw_w1_d, gsw_w1_x, gsw_w1_a, gsw_w1_b, gsw_b1, gsw_w2, gsw_b2,
    # classifiers
    cw_w, cw_b, cs_w, cs_b,
    # outputs
    z_w_ref, z_s_ref, xaw_ref, xas_ref, xbw_ref, xbs_ref,
    logits_w_ref, logits_s_ref,
):
    f32 = jnp.float32

    def mlp(x, w1_ref, b1_ref, w2_ref, b2_ref):
        h = jnp.dot(x, w1_ref[...], preferred_element_type=f32) + b1_ref[...]
        h = jnp.maximum(h, 0.0)
        return jnp.dot(h, w2_ref[...], preferred_element_type=f32) + b2_ref[...]

    def g_apply(a, w1a_ref, b, w1b_ref, b1_ref, w2_ref, b2_ref):
        # Replaces concat([a, b], -1) @ W1 with split-W1 sums (no 2L-wide HBM tensor).
        h = (jnp.dot(a, w1a_ref[...], preferred_element_type=f32)
             + jnp.dot(b, w1b_ref[...], preferred_element_type=f32)
             + b1_ref[...])
        h = jnp.maximum(h, 0.0)
        return jnp.dot(h, w2_ref[...], preferred_element_type=f32) + b2_ref[...]

    x_w = x_w_ref[...].astype(f32)          # [S, Dw]
    x_s = x_s_ref[...].astype(f32)          # [S, Ds]
    d_w = d_w_ref[...].astype(f32)          # [1, L]
    d_s = d_s_ref[...].astype(f32)          # [1, L]
    s_len = x_w.shape[0]

    # encoders
    z_w = mlp(x_w, ew_w1, ew_b1, ew_w2, ew_b2)          # [S, L]
    z_s = mlp(x_s, es_w1, es_b1, es_w2, es_b2)          # [S, L]

    # decoders: d_w / d_s ride along as one extra row -> one matmul per decoder
    dec_w = mlp(jnp.concatenate([z_w, d_w], axis=0), dw_w1, dw_b1, dw_w2, dw_b2)     # [S+1, Dw]
    dec_s = mlp(jnp.concatenate([z_s, d_s], axis=0), dsd_w1, dsd_b1, dsd_w2, dsd_b2)  # [S+1, Ds]
    x_w_recon, d_w_recon = dec_w[:s_len], dec_w[s_len:]   # [S,Dw], [1,Dw]
    x_s_recon, d_s_recon = dec_s[:s_len], dec_s[s_len:]   # [S,Ds], [1,Ds]

    # alpha stage: g_ws(cat([d_w_recon, x_s_recon])) / g_sw(cat([d_s_recon, x_w_recon]))
    x_alpha_w = g_apply(d_w_recon, gws_w1_d, x_s_recon, gws_w1_x, gws_b1, gws_w2, gws_b2)
    x_alpha_s = g_apply(d_s_recon, gsw_w1_d, x_w_recon, gsw_w1_x, gsw_b1, gsw_w2, gsw_b2)
    # beta stage: g_ws(cat([x_alpha_w, x_alpha_s])) / g_sw(cat([x_alpha_s, x_alpha_w]))
    x_beta_w = g_apply(x_alpha_w, gws_w1_a, x_alpha_s, gws_w1_b, gws_b1, gws_w2, gws_b2)
    x_beta_s = g_apply(x_alpha_s, gsw_w1_a, x_alpha_w, gsw_w1_b, gsw_b1, gsw_w2, gsw_b2)

    # classifiers: mean over sequence + linear
    zm_w = jnp.mean(z_w, axis=0, keepdims=True)          # [1, L]
    zm_s = jnp.mean(z_s, axis=0, keepdims=True)
    logits_w_ref[...] = (jnp.dot(zm_w, cw_w[...], preferred_element_type=f32)
                         + cw_b[...]).astype(logits_w_ref.dtype)
    logits_s_ref[...] = (jnp.dot(zm_s, cs_w[...], preferred_element_type=f32)
                         + cs_b[...]).astype(logits_s_ref.dtype)

    z_w_ref[...] = z_w.astype(z_w_ref.dtype)
    z_s_ref[...] = z_s.astype(z_s_ref.dtype)
    xaw_ref[...] = x_alpha_w.astype(xaw_ref.dtype)
    xas_ref[...] = x_alpha_s.astype(xas_ref.dtype)
    xbw_ref[...] = x_beta_w.astype(xbw_ref.dtype)
    xbs_ref[...] = x_beta_s.astype(xbs_ref.dtype)


# ---------------------------------------------------------------------------
# Kernel B: contrastive loss + BCE reconstruction loss, one launch, one output.
# The six latent tensors come in directly (no wrapper concat / HBM round trip).
# ---------------------------------------------------------------------------
def crn_losses_kernel(z_w_ref, z_s_ref, xaw_ref, xas_ref, xbw_ref, xbs_ref,
                      logits_w_ref, logits_s_ref, targets_ref, o_ref,
                      *, temperature):
    f32 = jnp.float32

    feats = []
    for r in (z_w_ref, z_s_ref, xaw_ref, xas_ref, xbw_ref, xbs_ref):
        v = r[...].astype(f32)
        b, s, l = v.shape
        feats.append(v.reshape(b * s, l))
    bs = feats[0].shape[0]                      # = B * S
    pool = jnp.concatenate(feats, axis=0)       # [N, L], N = 6*B*S
    n = pool.shape[0]

    # L2 normalization (F.normalize, p=2, eps=1e-12) via rsqrt on the EUP.
    sumsq = jnp.sum(pool * pool, axis=1, keepdims=True)
    pool = pool * jax.lax.rsqrt(jnp.maximum(sumsq, 1e-24))

    # sim = (pool @ pool.T) / T, contraction fed to the MXU without a transpose.
    sim = jax.lax.dot_general(
        pool, pool, dimension_numbers=(((1,), (1,)), ((), ())),
        preferred_element_type=f32) * (1.0 / temperature)

    # Positive mask: labels = arange(bs).repeat(6)  =>  row r has label r % bs;
    # each row has exactly 5 positives (6 copies minus self), so the masked NLL
    # simplifies to  lse_i - mean_{positives} sim_ij  (no N x N log-prob temporary).
    rid = jax.lax.broadcasted_iota(jnp.int32, (n, n), 0)
    cid = jax.lax.broadcasted_iota(jnp.int32, (n, n), 1)
    pos = jnp.logical_and((rid % bs) == (cid % bs), rid != cid)

    m = jnp.max(sim, axis=1, keepdims=True)
    lse = m + jnp.log(jnp.sum(jnp.exp(sim - m), axis=1, keepdims=True))    # [n,1]
    pos_sum = jnp.sum(jnp.where(pos, sim, 0.0), axis=1, keepdims=True)     # [n,1]
    c_loss = jnp.mean(lse - pos_sum * (1.0 / 5.0))

    # BCE-with-logits:  0.01 * bce(logits_w) + 0.1 * bce(logits_s)
    t = targets_ref[...].astype(f32)

    def bce(x):
        x = x.astype(f32)
        return jnp.mean(jnp.maximum(x, 0.0) - x * t + jnp.log1p(jnp.exp(-jnp.abs(x))))

    o_ref[0, 0] = c_loss
    o_ref[0, 1] = 0.01 * bce(logits_w_ref[...]) + 0.1 * bce(logits_s_ref[...])
    # TODO(synk): for very large pools (6*B*S in the thousands) this single-block sim
    # matrix should be replaced with a flash-style row/col-tiled masked log-softmax;
    # the optional `queue` input of the PyTorch module is also not wired in.


def crn_losses(z_w, z_s, xaw, xas, xbw, xbs, logits_w, logits_s, targets, temperature):
    out = pl.pallas_call(
        functools.partial(crn_losses_kernel, temperature=float(temperature)),
        out_shape=jax.ShapeDtypeStruct((1, 2), jnp.float32),
        in_specs=[pl.BlockSpec(memory_space=VMEM)] * 9,
        out_specs=pl.BlockSpec(memory_space=VMEM),
        compiler_params=pltpu.CompilerParams(vmem_limit_bytes=_VMEM_LIMIT),
    )(z_w, z_s, xaw, xas, xbw, xbs, logits_w, logits_s, targets)
    return out[0, 0], out[0, 1]


# ---------------------------------------------------------------------------
# Parameter construction (mirrors the nn.Module __init__ shapes)
# ---------------------------------------------------------------------------
def _linear(key, in_dim, out_dim, scale=0.05):
    kw, kb = jax.random.split(key)
    w = scale * jax.random.normal(kw, (in_dim, out_dim), jnp.float32)
    b = scale * jax.random.normal(kb, (1, out_dim), jnp.float32)
    return w, b


def _mlp2_params(key, in_dim, hid_dim, out_dim):
    k1, k2 = jax.random.split(key)
    w1, b1 = _linear(k1, in_dim, hid_dim)
    w2, b2 = _linear(k2, hid_dim, out_dim)
    return (w1, b1, w2, b2)


def init_crn_params(key, input_dim_w, input_dim_s, latent_dim, num_labels):
    ks = jax.random.split(key, 10)
    return {
        "encoder_w": _mlp2_params(ks[0], input_dim_w, latent_dim, latent_dim),
        "encoder_s": _mlp2_params(ks[1], input_dim_s, latent_dim, latent_dim),
        "decoder_w": _mlp2_params(ks[2], latent_dim, latent_dim, input_dim_w),
        "decoder_s": _mlp2_params(ks[3], latent_dim, latent_dim, input_dim_s),
        "g_ws": _mlp2_params(ks[4], latent_dim * 2, latent_dim * 2, latent_dim),
        "g_sw": _mlp2_params(ks[5], latent_dim * 2, latent_dim * 2, latent_dim),
        "d_w": jax.random.normal(ks[6], (num_labels, latent_dim), jnp.float32),
        "d_s": jax.random.normal(ks[7], (num_labels, latent_dim), jnp.float32),
        "classifier_w": _linear(ks[8], latent_dim, num_labels),
        "classifier_s": _linear(ks[9], latent_dim, num_labels),
    }


# ---------------------------------------------------------------------------
# Forward pass (ContrastiveReconstructionNetwork.forward semantics)
# ---------------------------------------------------------------------------
def crn_forward(params, x_w, x_s, labels=None, queue=None, *, latent_dim, temperature):
    B, S, Dw = x_w.shape
    Ds = x_s.shape[-1]
    L = latent_dim
    C = params["d_w"].shape[0]
    # Same implicit constraint as the PyTorch module's concat feeding g_ws / g_sw.
    assert Dw + Ds == 2 * L, "input_dim_w + input_dim_s must equal 2 * latent_dim"

    if labels is not None:
        d_w = jnp.take(params["d_w"], labels, axis=0)            # [B, L]
        d_s = jnp.take(params["d_s"], labels, axis=0)
    else:
        d_w = jnp.broadcast_to(jnp.mean(params["d_w"], axis=0)[None], (B, L))
        d_s = jnp.broadcast_to(jnp.mean(params["d_s"], axis=0)[None], (B, L))

    gws_w1, gws_b1, gws_w2, gws_b2 = params["g_ws"]
    gsw_w1, gsw_b1, gsw_w2, gsw_b2 = params["g_sw"]
    cw_w, cw_b = params["classifier_w"]
    cs_w, cs_b = params["classifier_s"]

    inputs = (
        x_w, x_s, d_w.reshape(B, 1, L), d_s.reshape(B, 1, L),
        *params["encoder_w"], *params["encoder_s"],
        *params["decoder_w"], *params["decoder_s"],
        # g_ws: alpha split at Dw (d_w_recon | x_s_recon), beta split at L
        gws_w1[:Dw], gws_w1[Dw:], gws_w1[:L], gws_w1[L:], gws_b1, gws_w2, gws_b2,
        # g_sw: alpha split at Ds (d_s_recon | x_w_recon), beta split at L
        gsw_w1[:Ds], gsw_w1[Ds:], gsw_w1[:L], gsw_w1[L:], gsw_b1, gsw_w2, gsw_b2,
        cw_w, cw_b, cs_w, cs_b,
    )

    def wspec(a):  # full-array block, constant index_map -> stays VMEM-resident
        nd = a.ndim
        return pl.BlockSpec(a.shape, lambda b, _nd=nd: (0,) * _nd)

    in_specs = [
        pl.BlockSpec((None, S, Dw), lambda b: (b, 0, 0)),
        pl.BlockSpec((None, S, Ds), lambda b: (b, 0, 0)),
        pl.BlockSpec((None, 1, L), lambda b: (b, 0, 0)),
        pl.BlockSpec((None, 1, L), lambda b: (b, 0, 0)),
    ] + [wspec(a) for a in inputs[4:]]

    seq_spec = pl.BlockSpec((None, S, L), lambda b: (b, 0, 0))
    logit_spec = pl.BlockSpec((None, 1, C), lambda b: (b, 0, 0))
    out_specs = (seq_spec,) * 6 + (logit_spec, logit_spec)
    out_shape = tuple([jax.ShapeDtypeStruct((B, S, L), jnp.float32)] * 6
                      + [jax.ShapeDtypeStruct((B, 1, C), jnp.float32)] * 2)

    (z_w, z_s, x_alpha_w, x_alpha_s, x_beta_w, x_beta_s,
     logits_w3, logits_s3) = pl.pallas_call(
        crn_main_kernel,
        grid=(B,),
        out_shape=out_shape,
        in_specs=in_specs,
        out_specs=out_specs,
        compiler_params=pltpu.CompilerParams(
            dimension_semantics=("parallel",),
            vmem_limit_bytes=_VMEM_LIMIT),
    )(*inputs)

    logits_w = logits_w3.reshape(B, C)
    logits_s = logits_s3.reshape(B, C)

    outputs = {
        "x_alpha_w": x_alpha_w, "x_alpha_s": x_alpha_s,
        "x_beta_w": x_beta_w, "x_beta_s": x_beta_s,
        "logits_w": logits_w, "logits_s": logits_s,
    }

    if labels is not None:
        targets = jax.nn.one_hot(labels, C, dtype=jnp.float32)
        c_loss, r_loss = crn_losses(z_w, z_s, x_alpha_w, x_alpha_s, x_beta_w, x_beta_s,
                                    logits_w, logits_s, targets, temperature)
        outputs["contrastive_loss"] = c_loss
        outputs["recon_loss"] = r_loss

    return outputs


if __name__ == "__main__":
    # Small shapes consistent with the module (input_dim_w + input_dim_s == 2*latent_dim,
    # the same constraint the PyTorch concat into g_ws/g_sw imposes).
    B, S = 2, 8
    INPUT_DIM_W, INPUT_DIM_S, LATENT_DIM, NUM_LABELS = 40, 24, 32, 6
    TEMPERATURE = 0.1

    key = jax.random.PRNGKey(0)
    k_p, k_w, k_s = jax.random.split(key, 3)
    params = init_crn_params(k_p, INPUT_DIM_W, INPUT_DIM_S, LATENT_DIM, NUM_LABELS)

    x_w = jax.random.normal(k_w, (B, S, INPUT_DIM_W), jnp.float32)
    x_s = jax.random.normal(k_s, (B, S, INPUT_DIM_S), jnp.float32)
    labels = jnp.array([1, 3], dtype=jnp.int32)

    outputs = crn_forward(params, x_w, x_s, labels,
                          latent_dim=LATENT_DIM, temperature=TEMPERATURE)
    jax.block_until_ready(outputs)

    # Light sanity checks on shapes / finiteness.
    assert outputs["x_alpha_w"].shape == (B, S, LATENT_DIM)
    assert outputs["x_beta_s"].shape == (B, S, LATENT_DIM)
    assert outputs["logits_w"].shape == (B, NUM_LABELS)
    assert bool(jnp.isfinite(outputs["contrastive_loss"]))
    assert bool(jnp.isfinite(outputs["recon_loss"]))

    # Also exercise the labels=None branch (no losses).
    out_nolabel = crn_forward(params, x_w, x_s, None,
                              latent_dim=LATENT_DIM, temperature=TEMPERATURE)
    jax.block_until_ready(out_nolabel)
    assert "contrastive_loss" not in out_nolabel

    print("KERNEL_OK")
</pallas_src>

<mosaic_0001>
module attributes {stable_mosaic.version = 11 : i64} {
  func.func @crn_main_kernel(%arg0: i32, %arg1: memref<1x8x40xf32, #tpu.memory_space<vmem>>, %arg2: memref<1x8x24xf32, #tpu.memory_space<vmem>>, %arg3: memref<1x1x32xf32, #tpu.memory_space<vmem>>, %arg4: memref<1x1x32xf32, #tpu.memory_space<vmem>>, %arg5: memref<40x32xf32, #tpu.memory_space<vmem>>, %arg6: memref<1x32xf32, #tpu.memory_space<vmem>>, %arg7: memref<32x32xf32, #tpu.memory_space<vmem>>, %arg8: memref<1x32xf32, #tpu.memory_space<vmem>>, %arg9: memref<24x32xf32, #tpu.memory_space<vmem>>, %arg10: memref<1x32xf32, #tpu.memory_space<vmem>>, %arg11: memref<32x32xf32, #tpu.memory_space<vmem>>, %arg12: memref<1x32xf32, #tpu.memory_space<vmem>>, %arg13: memref<32x32xf32, #tpu.memory_space<vmem>>, %arg14: memref<1x32xf32, #tpu.memory_space<vmem>>, %arg15: memref<32x40xf32, #tpu.memory_space<vmem>>, %arg16: memref<1x40xf32, #tpu.memory_space<vmem>>, %arg17: memref<32x32xf32, #tpu.memory_space<vmem>>, %arg18: memref<1x32xf32, #tpu.memory_space<vmem>>, %arg19: memref<32x24xf32, #tpu.memory_space<vmem>>, %arg20: memref<1x24xf32, #tpu.memory_space<vmem>>, %arg21: memref<40x64xf32, #tpu.memory_space<vmem>>, %arg22: memref<24x64xf32, #tpu.memory_space<vmem>>, %arg23: memref<32x64xf32, #tpu.memory_space<vmem>>, %arg24: memref<32x64xf32, #tpu.memory_space<vmem>>, %arg25: memref<1x64xf32, #tpu.memory_space<vmem>>, %arg26: memref<64x32xf32, #tpu.memory_space<vmem>>, %arg27: memref<1x32xf32, #tpu.memory_space<vmem>>, %arg28: memref<24x64xf32, #tpu.memory_space<vmem>>, %arg29: memref<40x64xf32, #tpu.memory_space<vmem>>, %arg30: memref<32x64xf32, #tpu.memory_space<vmem>>, %arg31: memref<32x64xf32, #tpu.memory_space<vmem>>, %arg32: memref<1x64xf32, #tpu.memory_space<vmem>>, %arg33: memref<64x32xf32, #tpu.memory_space<vmem>>, %arg34: memref<1x32xf32, #tpu.memory_space<vmem>>, %arg35: memref<32x6xf32, #tpu.memory_space<vmem>>, %arg36: memref<1x6xf32, #tpu.memory_space<vmem>>, %arg37: memref<32x6xf32, #tpu.memory_space<vmem>>, %arg38: memref<1x6xf32, #tpu.memory_space<vmem>>, %arg39: memref<1x8x32xf32, #tpu.memory_space<vmem>>, %arg40: memref<1x8x32xf32, #tpu.memory_space<vmem>>, %arg41: memref<1x8x32xf32, #tpu.memory_space<vmem>>, %arg42: memref<1x8x32xf32, #tpu.memory_space<vmem>>, %arg43: memref<1x8x32xf32, #tpu.memory_space<vmem>>, %arg44: memref<1x8x32xf32, #tpu.memory_space<vmem>>, %arg45: memref<1x1x6xf32, #tpu.memory_space<vmem>>, %arg46: memref<1x1x6xf32, #tpu.memory_space<vmem>>) attributes {dimension_semantics = [#tpu.dimension_semantics<parallel>], iteration_bounds = array<i64: 2>, scalar_prefetch = 0 : i64, scratch_operands = 0 : i64, tpu.core_type = #tpu.core_type<tc>, window_params = [{transform_indices = @transform_0, window_bounds = array<i64: 1, 8, 40>}, {transform_indices = @transform_1, window_bounds = array<i64: 1, 8, 24>}, {transform_indices = @transform_2, window_bounds = array<i64: 1, 1, 32>}, {transform_indices = @transform_3, window_bounds = array<i64: 1, 1, 32>}, {pipeline_mode = #tpu.pipeline_mode<synchronous>, transform_indices = @transform_4, window_bounds = array<i64: 40, 32>}, {pipeline_mode = #tpu.pipeline_mode<synchronous>, transform_indices = @transform_5, window_bounds = array<i64: 1, 32>}, {pipeline_mode = #tpu.pipeline_mode<synchronous>, transform_indices = @transform_6, window_bounds = array<i64: 32, 32>}, {pipeline_mode = #tpu.pipeline_mode<synchronous>, transform_indices = @transform_7, window_bounds = array<i64: 1, 32>}, {pipeline_mode = #tpu.pipeline_mode<synchronous>, transform_indices = @transform_8, window_bounds = array<i64: 24, 32>}, {pipeline_mode = #tpu.pipeline_mode<synchronous>, transform_indices = @transform_9, window_bounds = array<i64: 1, 32>}, {pipeline_mode = #tpu.pipeline_mode<synchronous>, transform_indices = @transform_10, window_bounds = array<i64: 32, 32>}, {pipeline_mode = #tpu.pipeline_mode<synchronous>, transform_indices = @transform_11, window_bounds = array<i64: 1, 32>}, {pipeline_mode = #tpu.pipeline_mode<synchronous>, transform_indices = @transform_12, window_bounds = array<i64: 32, 32>}, {pipeline_mode = #tpu.pipeline_mode<synchronous>, transform_indices = @transform_13, window_bounds = array<i64: 1, 32>}, {pipeline_mode = #tpu.pipeline_mode<synchronous>, transform_indices = @transform_14, window_bounds = array<i64: 32, 40>}, {pipeline_mode = #tpu.pipeline_mode<synchronous>, transform_indices = @transform_15, window_bounds = array<i64: 1, 40>}, {pipeline_mode = #tpu.pipeline_mode<synchronous>, transform_indices = @transform_16, window_bounds = array<i64: 32, 32>}, {pipeline_mode = #tpu.pipeline_mode<synchronous>, transform_indices = @transform_17, window_bounds = array<i64: 1, 32>}, {pipeline_mode = #tpu.pipeline_mode<synchronous>, transform_indices = @transform_18, window_bounds = array<i64: 32, 24>}, {pipeline_mode = #tpu.pipeline_mode<synchronous>, transform_indices = @transform_19, window_bounds = array<i64: 1, 24>}, {pipeline_mode = #tpu.pipeline_mode<synchronous>, transform_indices = @transform_20, window_bounds = array<i64: 40, 64>}, {pipeline_mode = #tpu.pipeline_mode<synchronous>, transform_indices = @transform_21, window_bounds = array<i64: 24, 64>}, {pipeline_mode = #tpu.pipeline_mode<synchronous>, transform_indices = @transform_22, window_bounds = array<i64: 32, 64>}, {pipeline_mode = #tpu.pipeline_mode<synchronous>, transform_indices = @transform_23, window_bounds = array<i64: 32, 64>}, {pipeline_mode = #tpu.pipeline_mode<synchronous>, transform_indices = @transform_24, window_bounds = array<i64: 1, 64>}, {pipeline_mode = #tpu.pipeline_mode<synchronous>, transform_indices = @transform_25, window_bounds = array<i64: 64, 32>}, {pipeline_mode = #tpu.pipeline_mode<synchronous>, transform_indices = @transform_26, window_bounds = array<i64: 1, 32>}, {pipeline_mode = #tpu.pipeline_mode<synchronous>, transform_indices = @transform_27, window_bounds = array<i64: 24, 64>}, {pipeline_mode = #tpu.pipeline_mode<synchronous>, transform_indices = @transform_28, window_bounds = array<i64: 40, 64>}, {pipeline_mode = #tpu.pipeline_mode<synchronous>, transform_indices = @transform_29, window_bounds = array<i64: 32, 64>}, {pipeline_mode = #tpu.pipeline_mode<synchronous>, transform_indices = @transform_30, window_bounds = array<i64: 32, 64>}, {pipeline_mode = #tpu.pipeline_mode<synchronous>, transform_indices = @transform_31, window_bounds = array<i64: 1, 64>}, {pipeline_mode = #tpu.pipeline_mode<synchronous>, transform_indices = @transform_32, window_bounds = array<i64: 64, 32>}, {pipeline_mode = #tpu.pipeline_mode<synchronous>, transform_indices = @transform_33, window_bounds = array<i64: 1, 32>}, {pipeline_mode = #tpu.pipeline_mode<synchronous>, transform_indices = @transform_34, window_bounds = array<i64: 32, 6>}, {pipeline_mode = #tpu.pipeline_mode<synchronous>, transform_indices = @transform_35, window_bounds = array<i64: 1, 6>}, {pipeline_mode = #tpu.pipeline_mode<synchronous>, transform_indices = @transform_36, window_bounds = array<i64: 32, 6>}, {pipeline_mode = #tpu.pipeline_mode<synchronous>, transform_indices = @transform_37, window_bounds = array<i64: 1, 6>}, {transform_indices = @transform_38, window_bounds = array<i64: 1, 8, 32>}, {transform_indices = @transform_39, window_bounds = array<i64: 1, 8, 32>}, {transform_indices = @transform_40, window_bounds = array<i64: 1, 8, 32>}, {transform_indices = @transform_41, window_bounds = array<i64: 1, 8, 32>}, {transform_indices = @transform_42, window_bounds = array<i64: 1, 8, 32>}, {transform_indices = @transform_43, window_bounds = array<i64: 1, 8, 32>}, {transform_indices = @transform_44, window_bounds = array<i64: 1, 1, 6>}, {transform_indices = @transform_45, window_bounds = array<i64: 1, 1, 6>}]} {
    %c0 = arith.constant 0 : index
    %c0_0 = arith.constant 0 : index
    %c0_1 = arith.constant 0 : index
    %0 = vector.load %arg1[%c0, %c0_0, %c0_1] : memref<1x8x40xf32, #tpu.memory_space<vmem>>, vector<1x8x40xf32>
    %1 = vector.shape_cast %0 : vector<1x8x40xf32> to vector<8x40xf32>
    %c0_2 = arith.constant 0 : index
    %c0_3 = arith.constant 0 : index
    %c0_4 = arith.constant 0 : index
    %2 = vector.load %arg2[%c0_2, %c0_3, %c0_4] : memref<1x8x24xf32, #tpu.memory_space<vmem>>, vector<1x8x24xf32>
    %3 = vector.shape_cast %2 : vector<1x8x24xf32> to vector<8x24xf32>
    %c0_5 = arith.constant 0 : index
    %c0_6 = arith.constant 0 : index
    %c0_7 = arith.constant 0 : index
    %4 = vector.load %arg3[%c0_5, %c0_6, %c0_7] : memref<1x1x32xf32, #tpu.memory_space<vmem>>, vector<1x1x32xf32>
    %5 = vector.shape_cast %4 : vector<1x1x32xf32> to vector<1x32xf32>
    %c0_8 = arith.constant 0 : index
    %c0_9 = arith.constant 0 : index
    %c0_10 = arith.constant 0 : index
    %6 = vector.load %arg4[%c0_8, %c0_9, %c0_10] : memref<1x1x32xf32, #tpu.memory_space<vmem>>, vector<1x1x32xf32>
    %7 = vector.shape_cast %6 : vector<1x1x32xf32> to vector<1x32xf32>
    %c0_11 = arith.constant 0 : index
    %c0_12 = arith.constant 0 : index
    %8 = vector.load %arg5[%c0_11, %c0_12] : memref<40x32xf32, #tpu.memory_space<vmem>>, vector<40x32xf32>
    %cst = arith.constant dense<0.000000e+00> : vector<8x32xf32>
    %9 = tpu.matmul %1, %8, %cst {dimension_numbers = #tpu.dot_dimension_numbers<[1], [0], [0], [1], [0, 0, 1, 1], [], []>} : vector<8x40xf32>, vector<40x32xf32>, vector<8x32xf32> -> vector<8x32xf32>
    %c0_13 = arith.constant 0 : index
    %c0_14 = arith.constant 0 : index
    %10 = vector.load %arg6[%c0_13, %c0_14] : memref<1x32xf32, #tpu.memory_space<vmem>>, vector<1x32xf32>
    %11 = vector.broadcast %10 : vector<1x32xf32> to vector<8x32xf32>
    %12 = arith.addf %9, %11 : vector<8x32xf32>
    %cst_15 = arith.constant 0.000000e+00 : f32
    %13 = vector.broadcast %cst_15 : f32 to vector<8x32xf32>
    %14 = arith.maximumf %12, %13 : vector<8x32xf32>
    %c0_16 = arith.constant 0 : index
    %c0_17 = arith.constant 0 : index
    %15 = vector.load %arg7[%c0_16, %c0_17] : memref<32x32xf32, #tpu.memory_space<vmem>>, vector<32x32xf32>
    %cst_18 = arith.constant dense<0.000000e+00> : vector<8x32xf32>
    %16 = tpu.matmul %14, %15, %cst_18 {dimension_numbers = #tpu.dot_dimension_numbers<[1], [0], [0], [1], [0, 0, 1, 1], [], []>} : vector<8x32xf32>, vector<32x32xf32>, vector<8x32xf32> -> vector<8x32xf32>
    %c0_19 = arith.constant 0 : index
    %c0_20 = arith.constant 0 : index
    %17 = vector.load %arg8[%c0_19, %c0_20] : memref<1x32xf32, #tpu.memory_space<vmem>>, vector<1x32xf32>
    %18 = vector.broadcast %17 : vector<1x32xf32> to vector<8x32xf32>
    %19 = arith.addf %16, %18 : vector<8x32xf32>
    %c0_21 = arith.constant 0 : index
    %c0_22 = arith.constant 0 : index
    %20 = vector.load %arg9[%c0_21, %c0_22] : memref<24x32xf32, #tpu.memory_space<vmem>>, vector<24x32xf32>
    %cst_23 = arith.constant dense<0.000000e+00> : vector<8x32xf32>
    %21 = tpu.matmul %3, %20, %cst_23 {dimension_numbers = #tpu.dot_dimension_numbers<[1], [0], [0], [1], [0, 0, 1, 1], [], []>} : vector<8x24xf32>, vector<24x32xf32>, vector<8x32xf32> -> vector<8x32xf32>
    %c0_24 = arith.constant 0 : index
    %c0_25 = arith.constant 0 : index
    %22 = vector.load %arg10[%c0_24, %c0_25] : memref<1x32xf32, #tpu.memory_space<vmem>>, vector<1x32xf32>
    %23 = vector.broadcast %22 : vector<1x32xf32> to vector<8x32xf32>
    %24 = arith.addf %21, %23 : vector<8x32xf32>
    %cst_26 = arith.constant 0.000000e+00 : f32
    %25 = vector.broadcast %cst_26 : f32 to vector<8x32xf32>
    %26 = arith.maximumf %24, %25 : vector<8x32xf32>
    %c0_27 = arith.constant 0 : index
    %c0_28 = arith.constant 0 : index
    %27 = vector.load %arg11[%c0_27, %c0_28] : memref<32x32xf32, #tpu.memory_space<vmem>>, vector<32x32xf32>
    %cst_29 = arith.constant dense<0.000000e+00> : vector<8x32xf32>
    %28 = tpu.matmul %26, %27, %cst_29 {dimension_numbers = #tpu.dot_dimension_numbers<[1], [0], [0], [1], [0, 0, 1, 1], [], []>} : vector<8x32xf32>, vector<32x32xf32>, vector<8x32xf32> -> vector<8x32xf32>
    %c0_30 = arith.constant 0 : index
    %c0_31 = arith.constant 0 : index
    %29 = vector.load %arg12[%c0_30, %c0_31] : memref<1x32xf32, #tpu.memory_space<vmem>>, vector<1x32xf32>
    %30 = vector.broadcast %29 : vector<1x32xf32> to vector<8x32xf32>
    %31 = arith.addf %28, %30 : vector<8x32xf32>
    %32 = tpu.concatenate %19, %5 in 0 : vector<8x32xf32>, vector<1x32xf32> -> vector<9x32xf32>
    %c0_32 = arith.constant 0 : index
    %c0_33 = arith.constant 0 : index
    %33 = vector.load %arg13[%c0_32, %c0_33] : memref<32x32xf32, #tpu.memory_space<vmem>>, vector<32x32xf32>
    %cst_34 = arith.constant dense<0.000000e+00> : vector<9x32xf32>
    %34 = tpu.matmul %32, %33, %cst_34 {dimension_numbers = #tpu.dot_dimension_numbers<[1], [0], [0], [1], [0, 0, 1, 1], [], []>} : vector<9x32xf32>, vector<32x32xf32>, vector<9x32xf32> -> vector<9x32xf32>
    %c0_35 = arith.constant 0 : index
    %c0_36 = arith.constant 0 : index
    %35 = vector.load %arg14[%c0_35, %c0_36] : memref<1x32xf32, #tpu.memory_space<vmem>>, vector<1x32xf32>
    %36 = vector.broadcast %35 : vector<1x32xf32> to vector<9x32xf32>
    %37 = arith.addf %34, %36 : vector<9x32xf32>
    %cst_37 = arith.constant 0.000000e+00 : f32
    %38 = vector.broadcast %cst_37 : f32 to vector<9x32xf32>
    %39 = arith.maximumf %37, %38 : vector<9x32xf32>
    %c0_38 = arith.constant 0 : index
    %c0_39 = arith.constant 0 : index
    %40 = vector.load %arg15[%c0_38, %c0_39] : memref<32x40xf32, #tpu.memory_space<vmem>>, vector<32x40xf32>
    %cst_40 = arith.constant dense<0.000000e+00> : vector<9x40xf32>
    %41 = tpu.matmul %39, %40, %cst_40 {dimension_numbers = #tpu.dot_dimension_numbers<[1], [0], [0], [1], [0, 0, 1, 1], [], []>} : vector<9x32xf32>, vector<32x40xf32>, vector<9x40xf32> -> vector<9x40xf32>
    %c0_41 = arith.constant 0 : index
    %c0_42 = arith.constant 0 : index
    %42 = vector.load %arg16[%c0_41, %c0_42] : memref<1x40xf32, #tpu.memory_space<vmem>>, vector<1x40xf32>
    %43 = vector.broadcast %42 : vector<1x40xf32> to vector<9x40xf32>
    %44 = arith.addf %41, %43 : vector<9x40xf32>
    %45 = tpu.concatenate %31, %7 in 0 : vector<8x32xf32>, vector<1x32xf32> -> vector<9x32xf32>
    %c0_43 = arith.constant 0 : index
    %c0_44 = arith.constant 0 : index
    %46 = vector.load %arg17[%c0_43, %c0_44] : memref<32x32xf32, #tpu.memory_space<vmem>>, vector<32x32xf32>
    %cst_45 = arith.constant dense<0.000000e+00> : vector<9x32xf32>
    %47 = tpu.matmul %45, %46, %cst_45 {dimension_numbers = #tpu.dot_dimension_numbers<[1], [0], [0], [1], [0, 0, 1, 1], [], []>} : vector<9x32xf32>, vector<32x32xf32>, vector<9x32xf32> -> vector<9x32xf32>
    %c0_46 = arith.constant 0 : index
    %c0_47 = arith.constant 0 : index
    %48 = vector.load %arg18[%c0_46, %c0_47] : memref<1x32xf32, #tpu.memory_space<vmem>>, vector<1x32xf32>
    %49 = vector.broadcast %48 : vector<1x32xf32> to vector<9x32xf32>
    %50 = arith.addf %47, %49 : vector<9x32xf32>
    %cst_48 = arith.constant 0.000000e+00 : f32
    %51 = vector.broadcast %cst_48 : f32 to vector<9x32xf32>
    %52 = arith.maximumf %50, %51 : vector<9x32xf32>
    %c0_49 = arith.constant 0 : index
    %c0_50 = arith.constant 0 : index
    %53 = vector.load %arg19[%c0_49, %c0_50] : memref<32x24xf32, #tpu.memory_space<vmem>>, vector<32x24xf32>
    %cst_51 = arith.constant dense<0.000000e+00> : vector<9x24xf32>
    %54 = tpu.matmul %52, %53, %cst_51 {dimension_numbers = #tpu.dot_dimension_numbers<[1], [0], [0], [1], [0, 0, 1, 1], [], []>} : vector<9x32xf32>, vector<32x24xf32>, vector<9x24xf32> -> vector<9x24xf32>
    %c0_52 = arith.constant 0 : index
    %c0_53 = arith.constant 0 : index
    %55 = vector.load %arg20[%c0_52, %c0_53] : memref<1x24xf32, #tpu.memory_space<vmem>>, vector<1x24xf32>
    %56 = vector.broadcast %55 : vector<1x24xf32> to vector<9x24xf32>
    %57 = arith.addf %54, %56 : vector<9x24xf32>
    %58 = vector.extract_strided_slice %44 {offsets = [0, 0], sizes = [8, 40], strides = [1, 1]} : vector<9x40xf32> to vector<8x40xf32>
    %59 = vector.extract_strided_slice %44 {offsets = [8, 0], sizes = [1, 40], strides = [1, 1]} : vector<9x40xf32> to vector<1x40xf32>
    %60 = vector.extract_strided_slice %57 {offsets = [0, 0], sizes = [8, 24], strides = [1, 1]} : vector<9x24xf32> to vector<8x24xf32>
    %61 = vector.extract_strided_slice %57 {offsets = [8, 0], sizes = [1, 24], strides = [1, 1]} : vector<9x24xf32> to vector<1x24xf32>
    %c0_54 = arith.constant 0 : index
    %c0_55 = arith.constant 0 : index
    %62 = vector.load %arg21[%c0_54, %c0_55] : memref<40x64xf32, #tpu.memory_space<vmem>>, vector<40x64xf32>
    %cst_56 = arith.constant dense<0.000000e+00> : vector<1x64xf32>
    %63 = tpu.matmul %59, %62, %cst_56 {dimension_numbers = #tpu.dot_dimension_numbers<[1], [0], [0], [1], [0, 0, 1, 1], [], []>} : vector<1x40xf32>, vector<40x64xf32>, vector<1x64xf32> -> vector<1x64xf32>
    %c0_57 = arith.constant 0 : index
    %c0_58 = arith.constant 0 : index
    %64 = vector.load %arg22[%c0_57, %c0_58] : memref<24x64xf32, #tpu.memory_space<vmem>>, vector<24x64xf32>
    %cst_59 = arith.constant dense<0.000000e+00> : vector<8x64xf32>
    %65 = tpu.matmul %60, %64, %cst_59 {dimension_numbers = #tpu.dot_dimension_numbers<[1], [0], [0], [1], [0, 0, 1, 1], [], []>} : vector<8x24xf32>, vector<24x64xf32>, vector<8x64xf32> -> vector<8x64xf32>
    %66 = vector.broadcast %63 : vector<1x64xf32> to vector<8x64xf32>
    %67 = arith.addf %66, %65 : vector<8x64xf32>
    %c0_60 = arith.constant 0 : index
    %c0_61 = arith.constant 0 : index
    %68 = vector.load %arg25[%c0_60, %c0_61] : memref<1x64xf32, #tpu.memory_space<vmem>>, vector<1x64xf32>
    %69 = vector.broadcast %68 : vector<1x64xf32> to vector<8x64xf32>
    %70 = arith.addf %67, %69 : vector<8x64xf32>
    %cst_62 = arith.constant 0.000000e+00 : f32
    %71 = vector.broadcast %cst_62 : f32 to vector<8x64xf32>
    %72 = arith.maximumf %70, %71 : vector<8x64xf32>
    %c0_63 = arith.constant 0 : index
    %c0_64 = arith.constant 0 : index
    %73 = vector.load %arg26[%c0_63, %c0_64] : memref<64x32xf32, #tpu.memory_space<vmem>>, vector<64x32xf32>
    %cst_65 = arith.constant dense<0.000000e+00> : vector<8x32xf32>
    %74 = tpu.matmul %72, %73, %cst_65 {dimension_numbers = #tpu.dot_dimension_numbers<[1], [0], [0], [1], [0, 0, 1, 1], [], []>} : vector<8x64xf32>, vector<64x32xf32>, vector<8x32xf32> -> vector<8x32xf32>
    %c0_66 = arith.constant 0 : index
    %c0_67 = arith.constant 0 : index
    %75 = vector.load %arg27[%c0_66, %c0_67] : memref<1x32xf32, #tpu.memory_space<vmem>>, vector<1x32xf32>
    %76 = vector.broadcast %75 : vector<1x32xf32> to vector<8x32xf32>
    %77 = arith.addf %74, %76 : vector<8x32xf32>
    %c0_68 = arith.constant 0 : index
    %c0_69 = arith.constant 0 : index
    %78 = vector.load %arg28[%c0_68, %c0_69] : memref<24x64xf32, #tpu.memory_space<vmem>>, vector<24x64xf32>
    %cst_70 = arith.constant dense<0.000000e+00> : vector<1x64xf32>
    %79 = tpu.matmul %61, %78, %cst_70 {dimension_numbers = #tpu.dot_dimension_numbers<[1], [0], [0], [1], [0, 0, 1, 1], [], []>} : vector<1x24xf32>, vector<24x64xf32>, vector<1x64xf32> -> vector<1x64xf32>
    %c0_71 = arith.constant 0 : index
    %c0_72 = arith.constant 0 : index
    %80 = vector.load %arg29[%c0_71, %c0_72] : memref<40x64xf32, #tpu.memory_space<vmem>>, vector<40x64xf32>
    %cst_73 = arith.constant dense<0.000000e+00> : vector<8x64xf32>
    %81 = tpu.matmul %58, %80, %cst_73 {dimension_numbers = #tpu.dot_dimension_numbers<[1], [0], [0], [1], [0, 0, 1, 1], [], []>} : vector<8x40xf32>, vector<40x64xf32>, vector<8x64xf32> -> vector<8x64xf32>
    %82 = vector.broadcast %79 : vector<1x64xf32> to vector<8x64xf32>
    %83 = arith.addf %82, %81 : vector<8x64xf32>
    %c0_74 = arith.constant 0 : index
    %c0_75 = arith.constant 0 : index
    %84 = vector.load %arg32[%c0_74, %c0_75] : memref<1x64xf32, #tpu.memory_space<vmem>>, vector<1x64xf32>
    %85 = vector.broadcast %84 : vector<1x64xf32> to vector<8x64xf32>
    %86 = arith.addf %83, %85 : vector<8x64xf32>
    %cst_76 = arith.constant 0.000000e+00 : f32
    %87 = vector.broadcast %cst_76 : f32 to vector<8x64xf32>
    %88 = arith.maximumf %86, %87 : vector<8x64xf32>
    %c0_77 = arith.constant 0 : index
    %c0_78 = arith.constant 0 : index
    %89 = vector.load %arg33[%c0_77, %c0_78] : memref<64x32xf32, #tpu.memory_space<vmem>>, vector<64x32xf32>
    %cst_79 = arith.constant dense<0.000000e+00> : vector<8x32xf32>
    %90 = tpu.matmul %88, %89, %cst_79 {dimension_numbers = #tpu.dot_dimension_numbers<[1], [0], [0], [1], [0, 0, 1, 1], [], []>} : vector<8x64xf32>, vector<64x32xf32>, vector<8x32xf32> -> vector<8x32xf32>
    %c0_80 = arith.constant 0 : index
    %c0_81 = arith.constant 0 : index
    %91 = vector.load %arg34[%c0_80, %c0_81] : memref<1x32xf32, #tpu.memory_space<vmem>>, vector<1x32xf32>
    %92 = vector.broadcast %91 : vector<1x32xf32> to vector<8x32xf32>
    %93 = arith.addf %90, %92 : vector<8x32xf32>
    %c0_82 = arith.constant 0 : index
    %c0_83 = arith.constant 0 : index
    %94 = vector.load %arg23[%c0_82, %c0_83] : memref<32x64xf32, #tpu.memory_space<vmem>>, vector<32x64xf32>
    %cst_84 = arith.constant dense<0.000000e+00> : vector<8x64xf32>
    %95 = tpu.matmul %77, %94, %cst_84 {dimension_numbers = #tpu.dot_dimension_numbers<[1], [0], [0], [1], [0, 0, 1, 1], [], []>} : vector<8x32xf32>, vector<32x64xf32>, vector<8x64xf32> -> vector<8x64xf32>
    %c0_85 = arith.constant 0 : index
    %c0_86 = arith.constant 0 : index
    %96 = vector.load %arg24[%c0_85, %c0_86] : memref<32x64xf32, #tpu.memory_space<vmem>>, vector<32x64xf32>
    %cst_87 = arith.constant dense<0.000000e+00> : vector<8x64xf32>
    %97 = tpu.matmul %93, %96, %cst_87 {dimension_numbers = #tpu.dot_dimension_numbers<[1], [0], [0], [1], [0, 0, 1, 1], [], []>} : vector<8x32xf32>, vector<32x64xf32>, vector<8x64xf32> -> vector<8x64xf32>
    %98 = arith.addf %95, %97 : vector<8x64xf32>
    %c0_88 = arith.constant 0 : index
    %c0_89 = arith.constant 0 : index
    %99 = vector.load %arg25[%c0_88, %c0_89] : memref<1x64xf32, #tpu.memory_space<vmem>>, vector<1x64xf32>
    %100 = vector.broadcast %99 : vector<1x64xf32> to vector<8x64xf32>
    %101 = arith.addf %98, %100 : vector<8x64xf32>
    %cst_90 = arith.constant 0.000000e+00 : f32
    %102 = vector.broadcast %cst_90 : f32 to vector<8x64xf32>
    %103 = arith.maximumf %101, %102 : vector<8x64xf32>
    %c0_91 = arith.constant 0 : index
    %c0_92 = arith.constant 0 : index
    %104 = vector.load %arg26[%c0_91, %c0_92] : memref<64x32xf32, #tpu.memory_space<vmem>>, vector<64x32xf32>
    %cst_93 = arith.constant dense<0.000000e+00> : vector<8x32xf32>
    %105 = tpu.matmul %103, %104, %cst_93 {dimension_numbers = #tpu.dot_dimension_numbers<[1], [0], [0], [1], [0, 0, 1, 1], [], []>} : vector<8x64xf32>, vector<64x32xf32>, vector<8x32xf32> -> vector<8x32xf32>
    %c0_94 = arith.constant 0 : index
    %c0_95 = arith.constant 0 : index
    %106 = vector.load %arg27[%c0_94, %c0_95] : memref<1x32xf32, #tpu.memory_space<vmem>>, vector<1x32xf32>
    %107 = vector.broadcast %106 : vector<1x32xf32> to vector<8x32xf32>
    %108 = arith.addf %105, %107 : vector<8x32xf32>
    %c0_96 = arith.constant 0 : index
    %c0_97 = arith.constant 0 : index
    %109 = vector.load %arg30[%c0_96, %c0_97] : memref<32x64xf32, #tpu.memory_space<vmem>>, vector<32x64xf32>
    %cst_98 = arith.constant dense<0.000000e+00> : vector<8x64xf32>
    %110 = tpu.matmul %93, %109, %cst_98 {dimension_numbers = #tpu.dot_dimension_numbers<[1], [0], [0], [1], [0, 0, 1, 1], [], []>} : vector<8x32xf32>, vector<32x64xf32>, vector<8x64xf32> -> vector<8x64xf32>
    %c0_99 = arith.constant 0 : index
    %c0_100 = arith.constant 0 : index
    %111 = vector.load %arg31[%c0_99, %c0_100] : memref<32x64xf32, #tpu.memory_space<vmem>>, vector<32x64xf32>
    %cst_101 = arith.constant dense<0.000000e+00> : vector<8x64xf32>
    %112 = tpu.matmul %77, %111, %cst_101 {dimension_numbers = #tpu.dot_dimension_numbers<[1], [0], [0], [1], [0, 0, 1, 1], [], []>} : vector<8x32xf32>, vector<32x64xf32>, vector<8x64xf32> -> vector<8x64xf32>
    %113 = arith.addf %110, %112 : vector<8x64xf32>
    %c0_102 = arith.constant 0 : index
    %c0_103 = arith.constant 0 : index
    %114 = vector.load %arg32[%c0_102, %c0_103] : memref<1x64xf32, #tpu.memory_space<vmem>>, vector<1x64xf32>
    %115 = vector.broadcast %114 : vector<1x64xf32> to vector<8x64xf32>
    %116 = arith.addf %113, %115 : vector<8x64xf32>
    %cst_104 = arith.constant 0.000000e+00 : f32
    %117 = vector.broadcast %cst_104 : f32 to vector<8x64xf32>
    %118 = arith.maximumf %116, %117 : vector<8x64xf32>
    %c0_105 = arith.constant 0 : index
    %c0_106 = arith.constant 0 : index
    %119 = vector.load %arg33[%c0_105, %c0_106] : memref<64x32xf32, #tpu.memory_space<vmem>>, vector<64x32xf32>
    %cst_107 = arith.constant dense<0.000000e+00> : vector<8x32xf32>
    %120 = tpu.matmul %118, %119, %cst_107 {dimension_numbers = #tpu.dot_dimension_numbers<[1], [0], [0], [1], [0, 0, 1, 1], [], []>} : vector<8x64xf32>, vector<64x32xf32>, vector<8x32xf32> -> vector<8x32xf32>
    %c0_108 = arith.constant 0 : index
    %c0_109 = arith.constant 0 : index
    %121 = vector.load %arg34[%c0_108, %c0_109] : memref<1x32xf32, #tpu.memory_space<vmem>>, vector<1x32xf32>
    %122 = vector.broadcast %121 : vector<1x32xf32> to vector<8x32xf32>
    %123 = arith.addf %120, %122 : vector<8x32xf32>
    %cst_110 = arith.constant dense<0.000000e+00> : vector<32xf32>
    %124 = vector.multi_reduction <add>, %19, %cst_110 [0] : vector<8x32xf32> to vector<32xf32>
    %125 = vector.shape_cast %124 : vector<32xf32> to vector<1x32xf32>
    %cst_111 = arith.constant 8.000000e+00 : f32
    %126 = vector.broadcast %cst_111 : f32 to vector<1x32xf32>
    %127 = arith.divf %125, %126 : vector<1x32xf32>
    %cst_112 = arith.constant dense<0.000000e+00> : vector<32xf32>
    %128 = vector.multi_reduction <add>, %31, %cst_112 [0] : vector<8x32xf32> to vector<32xf32>
    %129 = vector.shape_cast %128 : vector<32xf32> to vector<1x32xf32>
    %cst_113 = arith.constant 8.000000e+00 : f32
    %130 = vector.broadcast %cst_113 : f32 to vector<1x32xf32>
    %131 = arith.divf %129, %130 : vector<1x32xf32>
    %c0_114 = arith.constant 0 : index
    %c0_115 = arith.constant 0 : index
    %132 = vector.load %arg35[%c0_114, %c0_115] : memref<32x6xf32, #tpu.memory_space<vmem>>, vector<32x6xf32>
    %cst_116 = arith.constant dense<0.000000e+00> : vector<1x6xf32>
    %133 = tpu.matmul %127, %132, %cst_116 {dimension_numbers = #tpu.dot_dimension_numbers<[1], [0], [0], [1], [0, 0, 1, 1], [], []>} : vector<1x32xf32>, vector<32x6xf32>, vector<1x6xf32> -> vector<1x6xf32>
    %c0_117 = arith.constant 0 : index
    %c0_118 = arith.constant 0 : index
    %134 = vector.load %arg36[%c0_117, %c0_118] : memref<1x6xf32, #tpu.memory_space<vmem>>, vector<1x6xf32>
    %135 = arith.addf %133, %134 : vector<1x6xf32>
    %c0_119 = arith.constant 0 : index
    %c0_120 = arith.constant 0 : index
    %c0_121 = arith.constant 0 : index
    %136 = vector.load %arg45[%c0_119, %c0_120, %c0_121] : memref<1x1x6xf32, #tpu.memory_space<vmem>>, vector<1x1x6xf32>
    %137 = vector.shape_cast %136 : vector<1x1x6xf32> to vector<1x6xf32>
    %138 = vector.shape_cast %135 : vector<1x6xf32> to vector<1x1x6xf32>
    tpu.vector_store %arg45[%c0_119, %c0_120, %c0_121], %138 {strides = array<i32>} : memref<1x1x6xf32, #tpu.memory_space<vmem>>, vector<1x1x6xf32>,
    %c0_122 = arith.constant 0 : index
    %c0_123 = arith.constant 0 : index
    %139 = vector.load %arg37[%c0_122, %c0_123] : memref<32x6xf32, #tpu.memory_space<vmem>>, vector<32x6xf32>
    %cst_124 = arith.constant dense<0.000000e+00> : vector<1x6xf32>
    %140 = tpu.matmul %131, %139, %cst_124 {dimension_numbers = #tpu.dot_dimension_numbers<[1], [0], [0], [1], [0, 0, 1, 1], [], []>} : vector<1x32xf32>, vector<32x6xf32>, vector<1x6xf32> -> vector<1x6xf32>
    %c0_125 = arith.constant 0 : index
    %c0_126 = arith.constant 0 : index
    %141 = vector.load %arg38[%c0_125, %c0_126] : memref<1x6xf32, #tpu.memory_space<vmem>>, vector<1x6xf32>
    %142 = arith.addf %140, %141 : vector<1x6xf32>
    %c0_127 = arith.constant 0 : index
    %c0_128 = arith.constant 0 : index
    %c0_129 = arith.constant 0 : index
    %143 = vector.load %arg46[%c0_127, %c0_128, %c0_129] : memref<1x1x6xf32, #tpu.memory_space<vmem>>, vector<1x1x6xf32>
    %144 = vector.shape_cast %143 : vector<1x1x6xf32> to vector<1x6xf32>
    %145 = vector.shape_cast %142 : vector<1x6xf32> to vector<1x1x6xf32>
    tpu.vector_store %arg46[%c0_127, %c0_128, %c0_129], %145 {strides = array<i32>} : memref<1x1x6xf32, #tpu.memory_space<vmem>>, vector<1x1x6xf32>,
    %c0_130 = arith.constant 0 : index
    %c0_131 = arith.constant 0 : index
    %c0_132 = arith.constant 0 : index
    %146 = vector.load %arg39[%c0_130, %c0_131, %c0_132] : memref<1x8x32xf32, #tpu.memory_space<vmem>>, vector<1x8x32xf32>
    %147 = vector.shape_cast %146 : vector<1x8x32xf32> to vector<8x32xf32>
    %148 = vector.shape_cast %19 : vector<8x32xf32> to vector<1x8x32xf32>
    tpu.vector_store %arg39[%c0_130, %c0_131, %c0_132], %148 {strides = array<i32>} : memref<1x8x32xf32, #tpu.memory_space<vmem>>, vector<1x8x32xf32>,
    %c0_133 = arith.constant 0 : index
    %c0_134 = arith.constant 0 : index
    %c0_135 = arith.constant 0 : index
    %149 = vector.load %arg40[%c0_133, %c0_134, %c0_135] : memref<1x8x32xf32, #tpu.memory_space<vmem>>, vector<1x8x32xf32>
    %150 = vector.shape_cast %149 : vector<1x8x32xf32> to vector<8x32xf32>
    %151 = vector.shape_cast %31 : vector<8x32xf32> to vector<1x8x32xf32>
    tpu.vector_store %arg40[%c0_133, %c0_134, %c0_135], %151 {strides = array<i32>} : memref<1x8x32xf32, #tpu.memory_space<vmem>>, vector<1x8x32xf32>,
    %c0_136 = arith.constant 0 : index
    %c0_137 = arith.constant 0 : index
    %c0_138 = arith.constant 0 : index
    %152 = vector.load %arg41[%c0_136, %c0_137, %c0_138] : memref<1x8x32xf32, #tpu.memory_space<vmem>>, vector<1x8x32xf32>
    %153 = vector.shape_cast %152 : vector<1x8x32xf32> to vector<8x32xf32>
    %154 = vector.shape_cast %77 : vector<8x32xf32> to vector<1x8x32xf32>
    tpu.vector_store %arg41[%c0_136, %c0_137, %c0_138], %154 {strides = array<i32>} : memref<1x8x32xf32, #tpu.memory_space<vmem>>, vector<1x8x32xf32>,
    %c0_139 = arith.constant 0 : index
    %c0_140 = arith.constant 0 : index
    %c0_141 = arith.constant 0 : index
    %155 = vector.load %arg42[%c0_139, %c0_140, %c0_141] : memref<1x8x32xf32, #tpu.memory_space<vmem>>, vector<1x8x32xf32>
    %156 = vector.shape_cast %155 : vector<1x8x32xf32> to vector<8x32xf32>
    %157 = vector.shape_cast %93 : vector<8x32xf32> to vector<1x8x32xf32>
    tpu.vector_store %arg42[%c0_139, %c0_140, %c0_141], %157 {strides = array<i32>} : memref<1x8x32xf32, #tpu.memory_space<vmem>>, vector<1x8x32xf32>,
    %c0_142 = arith.constant 0 : index
    %c0_143 = arith.constant 0 : index
    %c0_144 = arith.constant 0 : index
    %158 = vector.load %arg43[%c0_142, %c0_143, %c0_144] : memref<1x8x32xf32, #tpu.memory_space<vmem>>, vector<1x8x32xf32>
    %159 = vector.shape_cast %158 : vector<1x8x32xf32> to vector<8x32xf32>
    %160 = vector.shape_cast %108 : vector<8x32xf32> to vector<1x8x32xf32>
    tpu.vector_store %arg43[%c0_142, %c0_143, %c0_144], %160 {strides = array<i32>} : memref<1x8x32xf32, #tpu.memory_space<vmem>>, vector<1x8x32xf32>,
    %c0_145 = arith.constant 0 : index
    %c0_146 = arith.constant 0 : index
    %c0_147 = arith.constant 0 : index
    %161 = vector.load %arg44[%c0_145, %c0_146, %c0_147] : memref<1x8x32xf32, #tpu.memory_space<vmem>>, vector<1x8x32xf32>
    %162 = vector.shape_cast %161 : vector<1x8x32xf32> to vector<8x32xf32>
    %163 = vector.shape_cast %123 : vector<8x32xf32> to vector<1x8x32xf32>
    tpu.vector_store %arg44[%c0_145, %c0_146, %c0_147], %163 {strides = array<i32>} : memref<1x8x32xf32, #tpu.memory_space<vmem>>, vector<1x8x32xf32>,
    return
  }
  func.func @transform_0(%arg0: i32) -> (i32, i32, i32) {
    %c0_i32 = arith.constant 0 : i32
    %c0_i32_0 = arith.constant 0 : i32
    %c0_i32_1 = arith.constant 0 : i32
    return %arg0, %c0_i32, %c0_i32_0 : i32, i32, i32
  }
  func.func @transform_1(%arg0: i32) -> (i32, i32, i32) {
    %c0_i32 = arith.constant 0 : i32
    %c0_i32_0 = arith.constant 0 : i32
    %c0_i32_1 = arith.constant 0 : i32
    return %arg0, %c0_i32, %c0_i32_0 : i32, i32, i32
  }
  func.func @transform_2(%arg0: i32) -> (i32, i32, i32) {
    %c0_i32 = arith.constant 0 : i32
    %c0_i32_0 = arith.constant 0 : i32
    %c0_i32_1 = arith.constant 0 : i32
    return %arg0, %c0_i32, %c0_i32_0 : i32, i32, i32
  }
  func.func @transform_3(%arg0: i32) -> (i32, i32, i32) {
    %c0_i32 = arith.constant 0 : i32
    %c0_i32_0 = arith.constant 0 : i32
    %c0_i32_1 = arith.constant 0 : i32
    return %arg0, %c0_i32, %c0_i32_0 : i32, i32, i32
  }
  func.func @transform_4(%arg0: i32) -> (i32, i32) {
    %c0_i32 = arith.constant 0 : i32
    %c0_i32_0 = arith.constant 0 : i32
    %c0_i32_1 = arith.constant 0 : i32
    return %c0_i32, %c0_i32_0 : i32, i32
  }
  func.func @transform_5(%arg0: i32) -> (i32, i32) {
    %c0_i32 = arith.constant 0 : i32
    %c0_i32_0 = arith.constant 0 : i32
    %c0_i32_1 = arith.constant 0 : i32
    return %c0_i32, %c0_i32_0 : i32, i32
  }
  func.func @transform_6(%arg0: i32) -> (i32, i32) {
    %c0_i32 = arith.constant 0 : i32
    %c0_i32_0 = arith.constant 0 : i32
    %c0_i32_1 = arith.constant 0 : i32
    return %c0_i32, %c0_i32_0 : i32, i32
  }
  func.func @transform_7(%arg0: i32) -> (i32, i32) {
    %c0_i32 = arith.constant 0 : i32
    %c0_i32_0 = arith.constant 0 : i32
    %c0_i32_1 = arith.constant 0 : i32
    return %c0_i32, %c0_i32_0 : i32, i32
  }
  func.func @transform_8(%arg0: i32) -> (i32, i32) {
    %c0_i32 = arith.constant 0 : i32
    %c0_i32_0 = arith.constant 0 : i32
    %c0_i32_1 = arith.constant 0 : i32
    return %c0_i32, %c0_i32_0 : i32, i32
  }
  func.func @transform_9(%arg0: i32) -> (i32, i32) {
    %c0_i32 = arith.constant 0 : i32
    %c0_i32_0 = arith.constant 0 : i32
    %c0_i32_1 = arith.constant 0 : i32
    return %c0_i32, %c0_i32_0 : i32, i32
  }
  func.func @transform_10(%arg0: i32) -> (i32, i32) {
    %c0_i32 = arith.constant 0 : i32
    %c0_i32_0 = arith.constant 0 : i32
    %c0_i32_1 = arith.constant 0 : i32
    return %c0_i32, %c0_i32_0 : i32, i32
  }
  func.func @transform_11(%arg0: i32) -> (i32, i32) {
    %c0_i32 = arith.constant 0 : i32
    %c0_i32_0 = arith.constant 0 : i32
    %c0_i32_1 = arith.constant 0 : i32
    return %c0_i32, %c0_i32_0 : i32, i32
  }
  func.func @transform_12(%arg0: i32) -> (i32, i32) {
    %c0_i32 = arith.constant 0 : i32
    %c0_i32_0 = arith.constant 0 : i32
    %c0_i32_1 = arith.constant 0 : i32
    return %c0_i32, %c0_i32_0 : i32, i32
  }
  func.func @transform_13(%arg0: i32) -> (i32, i32) {
    %c0_i32 = arith.constant 0 : i32
    %c0_i32_0 = arith.constant 0 : i32
    %c0_i32_1 = arith.constant 0 : i32
    return %c0_i32, %c0_i32_0 : i32, i32
  }
  func.func @transform_14(%arg0: i32) -> (i32, i32) {
    %c0_i32 = arith.constant 0 : i32
    %c0_i32_0 = arith.constant 0 : i32
    %c0_i32_1 = arith.constant 0 : i32
    return %c0_i32, %c0_i32_0 : i32, i32
  }
  func.func @transform_15(%arg0: i32) -> (i32, i32) {
    %c0_i32 = arith.constant 0 : i32
    %c0_i32_0 = arith.constant 0 : i32
    %c0_i32_1 = arith.constant 0 : i32
    return %c0_i32, %c0_i32_0 : i32, i32
  }
  func.func @transform_16(%arg0: i32) -> (i32, i32) {
    %c0_i32 = arith.constant 0 : i32
    %c0_i32_0 = arith.constant 0 : i32
    %c0_i32_1 = arith.constant 0 : i32
    return %c0_i32, %c0_i32_0 : i32, i32
  }
  func.func @transform_17(%arg0: i32) -> (i32, i32) {
    %c0_i32 = arith.constant 0 : i32
    %c0_i32_0 = arith.constant 0 : i32
    %c0_i32_1 = arith.constant 0 : i32
    return %c0_i32, %c0_i32_0 : i32, i32
  }
  func.func @transform_18(%arg0: i32) -> (i32, i32) {
    %c0_i32 = arith.constant 0 : i32
    %c0_i32_0 = arith.constant 0 : i32
    %c0_i32_1 = arith.constant 0 : i32
    return %c0_i32, %c0_i32_0 : i32, i32
  }
  func.func @transform_19(%arg0: i32) -> (i32, i32) {
    %c0_i32 = arith.constant 0 : i32
    %c0_i32_0 = arith.constant 0 : i32
    %c0_i32_1 = arith.constant 0 : i32
    return %c0_i32, %c0_i32_0 : i32, i32
  }
  func.func @transform_20(%arg0: i32) -> (i32, i32) {
    %c0_i32 = arith.constant 0 : i32
    %c0_i32_0 = arith.constant 0 : i32
    %c0_i32_1 = arith.constant 0 : i32
    return %c0_i32, %c0_i32_0 : i32, i32
  }
  func.func @transform_21(%arg0: i32) -> (i32, i32) {
    %c0_i32 = arith.constant 0 : i32
    %c0_i32_0 = arith.constant 0 : i32
    %c0_i32_1 = arith.constant 0 : i32
    return %c0_i32, %c0_i32_0 : i32, i32
  }
  func.func @transform_22(%arg0: i32) -> (i32, i32) {
    %c0_i32 = arith.constant 0 : i32
    %c0_i32_0 = arith.constant 0 : i32
    %c0_i32_1 = arith.constant 0 : i32
    return %c0_i32, %c0_i32_0 : i32, i32
  }
  func.func @transform_23(%arg0: i32) -> (i32, i32) {
    %c0_i32 = arith.constant 0 : i32
    %c0_i32_0 = arith.constant 0 : i32
    %c0_i32_1 = arith.constant 0 : i32
    return %c0_i32, %c0_i32_0 : i32, i32
  }
  func.func @transform_24(%arg0: i32) -> (i32, i32) {
    %c0_i32 = arith.constant 0 : i32
    %c0_i32_0 = arith.constant 0 : i32
    %c0_i32_1 = arith.constant 0 : i32
    return %c0_i32, %c0_i32_0 : i32, i32
  }
  func.func @transform_25(%arg0: i32) -> (i32, i32) {
    %c0_i32 = arith.constant 0 : i32
    %c0_i32_0 = arith.constant 0 : i32
    %c0_i32_1 = arith.constant 0 : i32
    return %c0_i32, %c0_i32_0 : i32, i32
  }
  func.func @transform_26(%arg0: i32) -> (i32, i32) {
    %c0_i32 = arith.constant 0 : i32
    %c0_i32_0 = arith.constant 0 : i32
    %c0_i32_1 = arith.constant 0 : i32
    return %c0_i32, %c0_i32_0 : i32, i32
  }
  func.func @transform_27(%arg0: i32) -> (i32, i32) {
    %c0_i32 = arith.constant 0 : i32
    %c0_i32_0 = arith.constant 0 : i32
    %c0_i32_1 = arith.constant 0 : i32
    return %c0_i32, %c0_i32_0 : i32, i32
  }
  func.func @transform_28(%arg0: i32) -> (i32, i32) {
    %c0_i32 = arith.constant 0 : i32
    %c0_i32_0 = arith.constant 0 : i32
    %c0_i32_1 = arith.constant 0 : i32
    return %c0_i32, %c0_i32_0 : i32, i32
  }
  func.func @transform_29(%arg0: i32) -> (i32, i32) {
    %c0_i32 = arith.constant 0 : i32
    %c0_i32_0 = arith.constant 0 : i32
    %c0_i32_1 = arith.constant 0 : i32
    return %c0_i32, %c0_i32_0 : i32, i32
  }
  func.func @transform_30(%arg0: i32) -> (i32, i32) {
    %c0_i32 = arith.constant 0 : i32
    %c0_i32_0 = arith.constant 0 : i32
    %c0_i32_1 = arith.constant 0 : i32
    return %c0_i32, %c0_i32_0 : i32, i32
  }
  func.func @transform_31(%arg0: i32) -> (i32, i32) {
    %c0_i32 = arith.constant 0 : i32
    %c0_i32_0 = arith.constant 0 : i32
    %c0_i32_1 = arith.constant 0 : i32
    return %c0_i32, %c0_i32_0 : i32, i32
  }
  func.func @transform_32(%arg0: i32) -> (i32, i32) {
    %c0_i32 = arith.constant 0 : i32
    %c0_i32_0 = arith.constant 0 : i32
    %c0_i32_1 = arith.constant 0 : i32
    return %c0_i32, %c0_i32_0 : i32, i32
  }
  func.func @transform_33(%arg0: i32) -> (i32, i32) {
    %c0_i32 = arith.constant 0 : i32
    %c0_i32_0 = arith.constant 0 : i32
    %c0_i32_1 = arith.constant 0 : i32
    return %c0_i32, %c0_i32_0 : i32, i32
  }
  func.func @transform_34(%arg0: i32) -> (i32, i32) {
    %c0_i32 = arith.constant 0 : i32
    %c0_i32_0 = arith.constant 0 : i32
    %c0_i32_1 = arith.constant 0 : i32
    return %c0_i32, %c0_i32_0 : i32, i32
  }
  func.func @transform_35(%arg0: i32) -> (i32, i32) {
    %c0_i32 = arith.constant 0 : i32
    %c0_i32_0 = arith.constant 0 : i32
    %c0_i32_1 = arith.constant 0 : i32
    return %c0_i32, %c0_i32_0 : i32, i32
  }
  func.func @transform_36(%arg0: i32) -> (i32, i32) {
    %c0_i32 = arith.constant 0 : i32
    %c0_i32_0 = arith.constant 0 : i32
    %c0_i32_1 = arith.constant 0 : i32
    return %c0_i32, %c0_i32_0 : i32, i32
  }
  func.func @transform_37(%arg0: i32) -> (i32, i32) {
    %c0_i32 = arith.constant 0 : i32
    %c0_i32_0 = arith.constant 0 : i32
    %c0_i32_1 = arith.constant 0 : i32
    return %c0_i32, %c0_i32_0 : i32, i32
  }
  func.func @transform_38(%arg0: i32) -> (i32, i32, i32) {
    %c0_i32 = arith.constant 0 : i32
    %c0_i32_0 = arith.constant 0 : i32
    %c0_i32_1 = arith.constant 0 : i32
    return %arg0, %c0_i32, %c0_i32_0 : i32, i32, i32
  }
  func.func @transform_39(%arg0: i32) -> (i32, i32, i32) {
    %c0_i32 = arith.constant 0 : i32
    %c0_i32_0 = arith.constant 0 : i32
    %c0_i32_1 = arith.constant 0 : i32
    return %arg0, %c0_i32, %c0_i32_0 : i32, i32, i32
  }
  func.func @transform_40(%arg0: i32) -> (i32, i32, i32) {
    %c0_i32 = arith.constant 0 : i32
    %c0_i32_0 = arith.constant 0 : i32
    %c0_i32_1 = arith.constant 0 : i32
    return %arg0, %c0_i32, %c0_i32_0 : i32, i32, i32
  }
  func.func @transform_41(%arg0: i32) -> (i32, i32, i32) {
    %c0_i32 = arith.constant 0 : i32
    %c0_i32_0 = arith.constant 0 : i32
    %c0_i32_1 = arith.constant 0 : i32
    return %arg0, %c0_i32, %c0_i32_0 : i32, i32, i32
  }
  func.func @transform_42(%arg0: i32) -> (i32, i32, i32) {
    %c0_i32 = arith.constant 0 : i32
    %c0_i32_0 = arith.constant 0 : i32
    %c0_i32_1 = arith.constant 0 : i32
    return %arg0, %c0_i32, %c0_i32_0 : i32, i32, i32
  }
  func.func @transform_43(%arg0: i32) -> (i32, i32, i32) {
    %c0_i32 = arith.constant 0 : i32
    %c0_i32_0 = arith.constant 0 : i32
    %c0_i32_1 = arith.constant 0 : i32
    return %arg0, %c0_i32, %c0_i32_0 : i32, i32, i32
  }
  func.func @transform_44(%arg0: i32) -> (i32, i32, i32) {
    %c0_i32 = arith.constant 0 : i32
    %c0_i32_0 = arith.constant 0 : i32
    %c0_i32_1 = arith.constant 0 : i32
    return %arg0, %c0_i32, %c0_i32_0 : i32, i32, i32
  }
  func.func @transform_45(%arg0: i32) -> (i32, i32, i32) {
    %c0_i32 = arith.constant 0 : i32
    %c0_i32_0 = arith.constant 0 : i32
    %c0_i32_1 = arith.constant 0 : i32
    return %arg0, %c0_i32, %c0_i32_0 : i32, i32, i32
  }
}

</mosaic_0001>

<bundles_post_ra>
// kernel: tpu_custom_call.1
= control target key start
LH: loop header
LB: loop body
LE: loop exit
PB: predicated region body
PF: predicated region fallthrough
CT: control target
= control target key end

     0   :  { %s5736_s6 = smov 1   ;;  %s5737_s10 = smov 2   ;;  %s6916_s0 = inlined_call_operand.smem [shape: u32[46], index: -1, kind: input, shape index: {}] }
   0x1   :  { %s5816_s5 = sld [smem:[%s6916_s0]]   ;;  %s5738_s14 = smov 3  }
   0x2   :  { %s5821_s9 = sld [smem:[%s6916_s0 + %s5736_s6]]   ;;  %s5739_s18 = smov 4  }
   0x3   :  { %s5826_s13 = sld [smem:[%s6916_s0 + %s5737_s10]]   ;;  %s5740_s22 = smov 5  }
   0x4   :  { %s5831_s17 = sld [smem:[%s6916_s0 + %s5738_s14]]   ;;  %s5741_s26 = smov 6  }
   0x5   :  { %s5836_s21 = sld [smem:[%s6916_s0 + %s5739_s18]]   ;;  %s5742_s30 = smov 7  }
   0x6   :  { %s5841_s25 = sld [smem:[%s6916_s0 + %s5740_s22]]   ;;  %s5743_s4 = smov 8  }
   0x7   :  { %6998 = sst [smem:[#allocation50_spill]] %s5816_s5  ;;  %s5744_s10 = smov 9  }
   0x8   :  { %6999 = sst [smem:[#allocation51_spill]] %s5821_s9  ;;  %s5745_s15 = smov 10  }
   0x9   :  { %7000 = sst [smem:[#allocation52_spill]] %s5826_s13  ;;  %s5746_s20 = smov 11  }
   0xa   :  { %s5846_s29 = sld [smem:[%s6916_s0 + %s5741_s26]]   ;;  %s5747_s26 = smov 12  }
   0xb   :  { %7001 = sst [smem:[#allocation53_spill]] %s5836_s21  ;;  %s5748_s1 = smov 13  }
   0xc   :  { %7002 = sst [smem:[#allocation54_spill]] %s5841_s25  ;;  %s5749_s7 = smov 14  }
   0xd   :  { %s5851_s3 = sld [smem:[%s6916_s0 + %s5742_s30]]   ;;  %s5751_s22 = smov 16  }
   0xe   :  { %s5856_s8 = sld [smem:[%s6916_s0 + %s5743_s4]]   ;;  %s5752_s28 = smov 17  }
   0xf   :  { %s5861_s14 = sld [smem:[%s6916_s0 + %s5744_s10]]  }
  0x10   :  { %7003 = sst [smem:[#allocation55_spill]] %s5846_s29 }
  0x11   :  { %s5866_s19 = sld [smem:[%s6916_s0 + %s5745_s15]]   ;;  %s5750_s15 = smov 15  }
  0x12   :  { %s5871_s24 = sld [smem:[%s6916_s0 + %s5746_s20]]  }
  0x13   :  { %7004 = sst [smem:[#allocation56_spill]] %s5851_s3 }
  0x14   :  { %7005 = sst [smem:[#allocation57_spill]] %s5856_s8 }
  0x15   :  { %7006 = sst [smem:[#allocation58_spill]] %s5861_s14 }
  0x16   :  { %s5876_s30 = sld [smem:[%s6916_s0 + %s5747_s26]]  }
  0x17   :  { %7007 = sst [smem:[#allocation59_spill]] %s5866_s19 }
  0x18   :  { %7008 = sst [smem:[#allocation60_spill]] %s5871_s24 }
  0x19   :  { %s5881_s6 = sld [smem:[%s6916_s0 + %s5748_s1]]  }
  0x1a   :  { %s5886_s12 = sld [smem:[%s6916_s0 + %s5749_s7]]   ;;  %s5753_s7 = smov 18  }
  0x1b   :  { %s5891_s20 = sld [smem:[%s6916_s0 + %s5750_s15]]   ;;  %s5754_s15 = smov 19  }
  0x1c   :  { %7009 = sst [smem:[#allocation61_spill]] %s5876_s30 }
  0x1d   :  { %s5896_s27 = sld [smem:[%s6916_s0 + %s5751_s22]]   ;;  %s5755_s22 = smov 20  }
  0x1e   :  { %s5901_s4 = sld [smem:[%s6916_s0 + %s5752_s28]]   ;;  %s5756_s28 = smov 21  }
  0x1f   :  { %7010 = sst [smem:[#allocation62_spill]] %s5881_s6 }
  0x20   :  { %7011 = sst [smem:[#allocation63_spill]] %s5886_s12 }
  0x21   :  { %7012 = sst [smem:[#allocation64_spill]] %s5891_s20 }
  0x22   :  { %s5906_s12 = sld [smem:[%s6916_s0 + %s5753_s7]]   ;;  %s5757_s7 = smov 22  }
  0x23   :  { %7013 = sst [smem:[#allocation65_spill]] %s5896_s27 }
  0x24   :  { %7014 = sst [smem:[#allocation66_spill]] %s5901_s4 }
  0x25   :  { %s5911_s13 = sld [smem:[%s6916_s0 + %s5754_s15]]   ;;  %s5758_s15 = smov 23  }
  0x26   :  { %s5916_s27 = sld [smem:[%s6916_s0 + %s5755_s22]]   ;;  %s5759_s22 = smov 24  }
  0x27   :  { %s5921_s30 = sld [smem:[%s6916_s0 + %s5756_s28]]   ;;  %s5760_s28 = smov 25  }
  0x28   :  { %7015 = sst [smem:[#allocation67_spill]] %s5906_s12 }
  0x29   :  { %s5926_s12 = sld [smem:[%s6916_s0 + %s5757_s7]]   ;;  %s5761_s7 = smov 26  }
  0x2a   :  { %s5931_s19 = sld [smem:[%s6916_s0 + %s5758_s15]]   ;;  %s5762_s15 = smov 27  }
  0x2b   :  { %7016 = sst [smem:[#allocation68_spill]] %s5911_s13 }
  0x2c   :  { %7017 = sst [smem:[#allocation69_spill]] %s5916_s27 }
  0x2d   :  { %7018 = sst [smem:[#allocation70_spill]] %s5921_s30 }
  0x2e   :  { %s5936_s27 = sld [smem:[%s6916_s0 + %s5759_s22]]   ;;  %s5763_s22 = smov 28  }
  0x2f   :  { %7019 = sst [smem:[#allocation71_spill]] %s5926_s12 }
  0x30   :  { %7020 = sst [smem:[#allocation72_spill]] %s5931_s19 }
  0x31   :  { %s5941_s30 = sld [smem:[%s6916_s0 + %s5760_s28]]   ;;  %s5764_s28 = smov 29  }
  0x32   :  { %s5946_s12 = sld [smem:[%s6916_s0 + %s5761_s7]]   ;;  %s5765_s7 = smov 30  }
  0x33   :  { %s5951_s19 = sld [smem:[%s6916_s0 + %s5762_s15]]   ;;  %s5766_s15 = smov 31  }
  0x34   :  { %s5956_s29 = sld [smem:[%s6916_s0 + %s5763_s22]]   ;;  %s5767_s22 = smov 32  }
  0x35   :  { %s5966_s21 = sld [smem:[%s6916_s0 + %s5765_s7]]   ;;  %s5769_s7 = smov 34  }
  0x37   :  { %7021 = sst [smem:[#allocation73_spill]] %s5941_s30 }
  0x38   :  { %7022 = sst [smem:[#allocation74_spill]] %s5946_s12 }
  0x39   :  { %7023 = sst [smem:[#allocation75_spill]] %s5951_s19 }
  0x3a   :  { %7024 = sst [smem:[#allocation76_spill]] %s5956_s29 }
  0x3b   :  { %s5961_s30 = sld [smem:[%s6916_s0 + %s5764_s28]]   ;;  %s5768_s28 = smov 33  }
  0x3c   :  { %7026 = sst [smem:[#allocation78_spill]] %s5966_s21 }
  0x3d   :  { %s5971_s19 = sld [smem:[%s6916_s0 + %s5766_s15]]   ;;  %s5770_s15 = smov 35  }
  0x3e   :  { %s5976_s29 = sld [smem:[%s6916_s0 + %s5767_s22]]   ;;  %s5771_s22 = smov 36  }
  0x3f   :  { %s5986_s21 = sld [smem:[%s6916_s0 + %s5769_s7]]   ;;  %s5773_s7 = smov 38  }
  0x41   :  { %7025 = sst [smem:[#allocation77_spill]] %s5961_s30 }
  0x42   :  { %s5981_s30 = sld [smem:[%s6916_s0 + %s5768_s28]]   ;;  %s5772_s28 = smov 37  }
  0x43   :  { %7027 = sst [smem:[#allocation79_spill]] %s5971_s19 }
  0x44   :  { %7028 = sst [smem:[#allocation80_spill]] %s5976_s29 }
  0x45   :  { %7030 = sst [smem:[#allocation82_spill]] %s5986_s21 }
  0x46   :  { %s5991_s19 = sld [smem:[%s6916_s0 + %s5770_s15]]   ;;  %s5774_s15 = smov 39  }
  0x47   :  { %s5996_s29 = sld [smem:[%s6916_s0 + %s5771_s22]]   ;;  %s5775_s22 = smov 40  }
  0x48   :  { %7029 = sst [smem:[#allocation81_spill]] %s5981_s30 }
  0x49   :  { %s6001_s30 = sld [smem:[%s6916_s0 + %s5772_s28]]   ;;  %s5776_s28 = smov 41  }
  0x4a   :  { %s6006_s21 = sld [smem:[%s6916_s0 + %s5773_s7]]   ;;  %s5777_s7 = smov 42  }
  0x4c   :  { %7031 = sst [smem:[#allocation83_spill]] %s5991_s19 }
  0x4d   :  { %7032 = sst [smem:[#allocation84_spill]] %s5996_s29 }
  0x4e   :  { %s6011_s19 = sld [smem:[%s6916_s0 + %s5774_s15]]   ;;  %s5778_s15 = smov 43  }
  0x4f   :  { %7033 = sst [smem:[#allocation85_spill]] %s6001_s30 }
  0x50   :  { %7034 = sst [smem:[#allocation86_spill]] %s6006_s21 }
  0x51   :  { %s6016_s29 = sld [smem:[%s6916_s0 + %s5775_s22]]   ;;  %s5779_s22 = smov 44  }
  0x52   :  { %s6021_s30 = sld [smem:[%s6916_s0 + %s5776_s28]]   ;;  %s5780_s28 = smov 45  }
  0x53   :  { %s6026_s21 = sld [smem:[%s6916_s0 + %s5777_s7]]  }
  0x54   :  { %7035 = sst [smem:[#allocation87_spill]] %s6011_s19 }
  0x55   :  { %s6031_s19 = sld [smem:[%s6916_s0 + %s5778_s15]]  }
  0x57   :  { %7036 = sst [smem:[#allocation88_spill]] %s6016_s29 }
  0x58   :  { %7037 = sst [smem:[#allocation89_spill]] %s6021_s30 }
  0x59   :  { %s6036_s29 = sld [smem:[%s6916_s0 + %s5779_s22]]  }
  0x5a   :  { %s6041_s30 = sld [smem:[%s6916_s0 + %s5780_s28]]  }
  0x5b   :  { %7038 = sst [smem:[#allocation90_spill]] %s6031_s19 }
  0x5f   :  { %7039 = sst [smem:[#allocation91_spill]] %s6036_s29 }
  0x60   :  { %97 = vsyncpa [#allocation3], 0 }
  0x61   :  { %99 = vsyncpa [#allocation3 + $0x1], 0 }
  0x62   :  { %100 = vsyncpa [#allocation6], 0 }
  0x63   :  { %102 = vsyncpa [#allocation6 + $0x1], 0 }
  0x64   :  { %103 = vsyncpa [#allocation9], 0 }
  0x65   :  { %104 = vsyncpa [#allocation12], 0 }
  0x66   :  { %105 = vsyncpa [#allocation15], 0 }
  0x67   :  { %106 = vsyncpa [#allocation18], 0 }
  0x68   :  { %107 = vsyncpa [#allocation21], 0 }
  0x69   :  { %108 = vsyncpa [#allocation24], 0 }
  0x6a   :  { %109 = vsyncpa [#allocation4], 0 }
  0x6b   :  { %111 = vsyncpa [#allocation4 + $0x1], 0 }
  0x6c   :  { %112 = vsyncpa [#allocation27], 0 }
  0x6d   :  { %114 = vsyncpa [#allocation27 + $0x1], 0 }
  0x6e   :  { %115 = vsyncpa [#allocation30], 0 }
  0x6f   :  { %117 = vsyncpa [#allocation30 + $0x1], 0 }
  0x70   :  { %118 = vsyncpa [#allocation33], 0 }
  0x71   :  { %120 = vsyncpa [#allocation33 + $0x1], 0 }
  0x72   :  { %121 = vsyncpa [#allocation36], 0 }
  0x73   :  { %123 = vsyncpa [#allocation36 + $0x1], 0  ;;  %s6043_s0 = smov 0   ;;  %s6045_s7 = smov 0  }
  0x74   :  { %s6047_s10 = smov 0   ;;  %s6049_s11 = smov 0  }
  0x75 LB: > { %s7040_s14 = sld [smem:[#allocation58_spill]]  ;;  %s7042_s6 = sld [smem:[#allocation62_spill]]  ;;  %s5734_s11 = sphi %s6049_s11, %s7137_s11   ;;  %s5730_s10 = sphi %s6047_s10, %s7139_s10   ;;  %s5726_s7 = sphi %s6045_s7, %s7141_s7   ;;  %s5722_s0 = sphi %s6043_s0, %s7140_s0  }
  0x76   : > { %s7041_s12 = sld [smem:[#allocation74_spill]]  ;;  %s7045_s3 = sld [smem:[#allocation56_spill]] }
  0x77   : > { %s7043_s5 = sld [smem:[#allocation50_spill]]  ;;  %s7046_s9 = sld [smem:[#allocation51_spill]] }
  0x78   : > { %s7044_s4 = sld [smem:[#allocation66_spill]]  ;;  %s7047_s24 = sld [smem:[#allocation60_spill]] }
  0x79   : > { %s7048_s20 = sld [smem:[#allocation64_spill]]  ;;  %s7049_s13 = sld [smem:[#allocation68_spill]] }
  0x7a   : > { %s7050_s8 = sld [smem:[#allocation57_spill]]  ;;  %s7051_s25 = sld [smem:[#allocation54_spill]] }
  0x7b   : > { %7052 = sst [smem:[#allocation92_spill]] %s5722_s0  ;;  %s5781_s15 = smov [#allocation8]  }
  0x7c   : > { %7053 = sst [smem:[#allocation93_spill]] %s5730_s10  ;;  %s1176_s16 = sshll.u32 %s5781_s15, 4  ;;  %s6069_s16 = int_to_ptr.vmem [resolvable:$true] %s1176_s16 }
  0x7d   : > { %s6064_s18 = sadd.s32 4294967295, %s5734_s11   ;;  %p4127_p0 = scmp.ge.s32.totalorder %s5734_s11, 1 }
  0x7e   : > { %p6941_p1 = scmp.eq.s32.totalorder %s6064_s18, 0  ;;  %p1160_p2 = scmp.lt.s32.totalorder %s5734_s11, 3 }
  0x7f   : > { %s5782_s23 = smov [#allocation11]   ;;  %s5783_s1 = smov [#allocation14]  }
  0x80   : > { %p6071_p3 = pnand %p4127_p0, %p1160_p2  ;;  %s1200_s26 = sshll.u32 %s5782_s23, 4  ;;  %s6078_s26 = int_to_ptr.vmem [resolvable:$true] %s1200_s26 }
  0x81   : > { %s1228_s2 = sshll.u32 %s5783_s1, 4  ;;  %s5030_s15 = scalar_lea.hbm %s7051_s25, 16  ;;  %s6086_s2 = int_to_ptr.vmem [resolvable:$true] %s1228_s2 }
  0x82   : > { %s7054_s22 = scalar_select %p6071_p3, 1, 0 }
  0x83   : > { %p4844_p5 = pneg %p6071_p3  ;;  %p5031_p7 = scmp.ne.s32.totalorder %s7051_s25, %s5030_s15 }
  0x84   : > { %p5037_p11 = scmp.lt.u32.totalorder %s5030_s15, %s7051_s25 }
  0x85   : > { %p6082_p6 = pnand %p4844_p5, %p6941_p1 }
  0x87   : > { %s7055_s28 = scalar_select %p6082_p6, 1, 0 }
  0x88   : > { %p6092_p8 = pneg %p6082_p6 }
  0x8a   : > { %s7056_s29 = scalar_select %p6092_p8, 1, 0 }
  0x8b   : > { %p5033_p9 = pnand %p6092_p8, %p5031_p7 }
  0x8d   : > { %p5034_p10 = pneg %p5033_p9 }
  0x8f   : > { %p5039_p12 = pnand %p5037_p11, %p5034_p10 }
  0x91   : > { %5042 = shalt.err (!%p5039_p12)
}
  0x92   : > { %s5043_s23 = scalar_lea.vmem %s6069_s16, 16  ;;  %s5050_s1 = scalar_lea.vmem %s6069_s16, 32 }
  0x93   : > { %p5044_p13 = scmp.ne.s32.totalorder %s6069_s16, %s5043_s23  ;;  %p5051_p5 = scmp.lt.s32.totalorder %s6069_s16, %s6069_s16 }
  0x94   : > { %p5052_p4 = scmp.lt.s32.totalorder %s5050_s1, %s5043_s23 }
  0x95   : > { %p5046_p0 = pnand %p5044_p13, %p6092_p8 }
  0x96   : > { %p5053_p1 = por %p5052_p4, %p5051_p5 }
  0x97   : > { %p5047_p2 = pneg %p5046_p0 }
  0x99   : > { %p5054_p7 = pnand %p5053_p1, %p5047_p2 }
  0x9b   : > { %5057 = shalt.err (!%p5054_p7)
}
  0x9c   : > { %4847 = dma.hbm_to_vmem [thread:$0]  (!%p6082_p6), %s7051_s25, 16, %s6069_s16, [#allocation9]  }
  0x9d   : > { %s5058_s15 = scalar_lea.hbm %s7050_s8, 384 }
  0x9e   : > { %p5059_p9 = scmp.ne.s32.totalorder %s7050_s8, %s5058_s15  ;;  %p5065_p12 = scmp.lt.u32.totalorder %s5058_s15, %s7050_s8 }
  0xa0   : > { %p5061_p10 = pnand %p5059_p9, %p6092_p8 }
  0xa2   : > { %p5062_p11 = pneg %p5061_p10 }
  0xa4   : > { %p5067_p13 = pnand %p5065_p12, %p5062_p11 }
  0xa6   : > { %5070 = shalt.err (!%p5067_p13)
}
  0xa7   : > { %s5071_s23 = scalar_lea.vmem %s6078_s26, 384  ;;  %p5079_p2 = scmp.lt.s32.totalorder %s6078_s26, %s6078_s26 }
  0xa8   : > { %p5072_p1 = scmp.ne.s32.totalorder %s6078_s26, %s5071_s23  ;;  %p5080_p5 = scmp.lt.s32.totalorder %s5071_s23, %s5071_s23 }
  0xaa   : > { %p5074_p4 = pnand %p5072_p1, %p6092_p8  ;;  %p5081_p7 = por %p5080_p5, %p5079_p2 }
  0xac   : > { %p5075_p0 = pneg %p5074_p4 }
  0xae   : > { %p5082_p3 = pnand %p5081_p7, %p5075_p0 }
  0xb0   : > { %5085 = shalt.err (!%p5082_p3)
}
  0xb1   : > { %s5784_s16 = smov 128   ;;  %s5785_s1 = smov 8  }
  0xb2   : > { %4853 = dma.hbm_to_vmem [thread:$0]  (!%p6082_p6), %s7050_s8, 384, %s6078_s26, [#allocation12], %s5784_s16, %s5784_s16, %s5785_s1  }
  0xb3   : > { %s5086_s15 = scalar_lea.hbm %s7047_s24, 16 }
  0xb4   : > { %p5087_p9 = scmp.ne.s32.totalorder %s7047_s24, %s5086_s15  ;;  %p5093_p12 = scmp.lt.u32.totalorder %s5086_s15, %s7047_s24 }
  0xb6   : > { %p5089_p10 = pnand %p5087_p9, %p6092_p8 }
  0xb8   : > { %p5090_p11 = pneg %p5089_p10 }
  0xba   : > { %p5095_p13 = pnand %p5093_p12, %p5090_p11 }
  0xbc   : > { %5098 = shalt.err (!%p5095_p13)
}
  0xbd   : > { %s5099_s23 = scalar_lea.vmem %s6086_s2, 16  ;;  %s5106_s25 = scalar_lea.vmem %s6086_s2, 32 }
  0xbe   : > { %p5100_p3 = scmp.ne.s32.totalorder %s6086_s2, %s5099_s23  ;;  %p5107_p0 = scmp.lt.s32.totalorder %s6086_s2, %s6086_s2 }
  0xbf   : > { %p5108_p2 = scmp.lt.s32.totalorder %s5106_s25, %s5099_s23 }
  0xc0   : > { %p5102_p1 = pnand %p5100_p3, %p6092_p8 }
  0xc1   : > { %p5109_p5 = por %p5108_p2, %p5107_p0 }
  0xc2   : > { %p5103_p4 = pneg %p5102_p1 }
  0xc4   : > { %p5110_p7 = pnand %p5109_p5, %p5103_p4 }
  0xc6   : > { %5113 = shalt.err (!%p5110_p7)
}
  0xc7   : > { %4859 = dma.hbm_to_vmem [thread:$0]  (!%p6082_p6), %s7047_s24, 16, %s6086_s2, [#allocation15]  }
  0xc8   : > { %s5786_s26 = smov [#allocation17]   ;;  %s5787_s1 = smov [#allocation20]  }
  0xc9   : > { %s1256_s16 = sshll.u32 %s5786_s26, 4  ;;  %s1284_s15 = sshll.u32 %s5787_s1, 4  ;;  %s1257_s16 = int_to_ptr.vmem [resolvable:$true] %s1256_s16  ;;  %s1285_s15 = int_to_ptr.vmem [resolvable:$true] %s1284_s15 }
  0xca   : > { %s5114_s8 = scalar_lea.hbm %s7048_s20, 16 }
  0xcb   : > { %p5115_p9 = scmp.ne.s32.totalorder %s7048_s20, %s5114_s8  ;;  %p5121_p12 = scmp.lt.u32.totalorder %s5114_s8, %s7048_s20 }
  0xcd   : > { %p5117_p10 = pnand %p5115_p9, %p6092_p8 }
  0xcf   : > { %p5118_p11 = pneg %p5117_p10 }
  0xd1   : > { %p5123_p13 = pnand %p5121_p12, %p5118_p11 }
  0xd3   : > { %5126 = shalt.err (!%p5123_p13)
}
  0xd4   : > { %s5127_s25 = scalar_lea.vmem %s1257_s16, 16  ;;  %s5134_s2 = scalar_lea.vmem %s1257_s16, 32 }
  0xd5   : > { %p5128_p3 = scmp.ne.s32.totalorder %s1257_s16, %s5127_s25  ;;  %p5135_p0 = scmp.lt.s32.totalorder %s1257_s16, %s1257_s16 }
  0xd6   : > { %p5136_p2 = scmp.lt.s32.totalorder %s5134_s2, %s5127_s25 }
  0xd7   : > { %p5130_p1 = pnand %p5128_p3, %p6092_p8 }
  0xd8   : > { %p5137_p5 = por %p5136_p2, %p5135_p0 }
  0xd9   : > { %p5131_p4 = pneg %p5130_p1 }
  0xdb   : > { %p5138_p7 = pnand %p5137_p5, %p5131_p4 }
  0xdd   : > { %5141 = shalt.err (!%p5138_p7)
}
  0xde   : > { %4865 = dma.hbm_to_vmem [thread:$0]  (!%p6082_p6), %s7048_s20, 16, %s1257_s16, [#allocation18]  }
  0xdf   : > { %s5142_s8 = scalar_lea.hbm %s7049_s13, 16 }
  0xe0   : > { %p5143_p9 = scmp.ne.s32.totalorder %s7049_s13, %s5142_s8  ;;  %p5149_p12 = scmp.lt.u32.totalorder %s5142_s8, %s7049_s13 }
  0xe2   : > { %p5145_p10 = pnand %p5143_p9, %p6092_p8 }
  0xe4   : > { %p5146_p11 = pneg %p5145_p10 }
  0xe6   : > { %p5151_p13 = pnand %p5149_p12, %p5146_p11 }
  0xe8   : > { %5154 = shalt.err (!%p5151_p13)
}
  0xe9   : > { %s5155_s23 = scalar_lea.vmem %s1285_s15, 16  ;;  %s5162_s26 = scalar_lea.vmem %s1285_s15, 32 }
  0xea   : > { %p5156_p3 = scmp.ne.s32.totalorder %s1285_s15, %s5155_s23  ;;  %p5163_p0 = scmp.lt.s32.totalorder %s1285_s15, %s1285_s15 }
  0xeb   : > { %p5164_p2 = scmp.lt.s32.totalorder %s5162_s26, %s5155_s23 }
  0xec   : > { %p5158_p1 = pnand %p5156_p3, %p6092_p8 }
  0xed   : > { %p5165_p5 = por %p5164_p2, %p5163_p0 }
  0xee   : > { %p5159_p4 = pneg %p5158_p1 }
  0xf0   : > { %p5166_p7 = pnand %p5165_p5, %p5159_p4 }
  0xf2   : > { %5169 = shalt.err (!%p5166_p7)
}
  0xf3   : > { %4871 = dma.hbm_to_vmem [thread:$0]  (!%p6082_p6), %s7049_s13, 16, %s1285_s15, [#allocation21]  }
  0xf4   : > { %s6948_s16 = sadd.s32 4294967294, %s5734_s11   ;;  %s6163_s1 = sadd.s32 1, %s5734_s11  }
  0xf5   : > { %7057 = sst [smem:[#allocation94_spill]] %s6163_s1  ;;  %s136_s25 = sadd.s32 1, %s5730_s10 }
  0xf6   : > { %s133_s2 = ssub.s32 %s5734_s11, %s6163_s1  ;;  %p143_p9 = scmp.ne.s32.totalorder %s5730_s10, %s5726_s7 }
  0xf7   : > { %p134_p10 = scmp.eq.s32.totalorder %s133_s2, 0  ;;  %p144_p11 = scmp.eq.s32.totalorder %s5734_s11, 0 }
  0xf8   : > { %p149_p12 = scmp.ne.s32.totalorder %s5726_s7, %s5722_s0  ;;  %p965_p13 = scmp.eq.s32.totalorder %s6064_s18, 1 }
  0xf9   : > { %s6175_s8 = scalar_select %p134_p10, %s5730_s10, %s136_s25  }
  0xfa   : > { %p145_p3 = por %p144_p11, %p143_p9  ;;  %p7059_p1 = scmp.eq.s32.totalorder %s6064_s18, 0 }
  0xfb   : > { %7058 = sst [smem:[#allocation95_spill]] %s6175_s8  ;;  %p6183_p0 = por %p965_p13, %p143_p9 }
  0xfc   : > { %p6179_p4 = por %p7059_p1, %p149_p12  ;;  %p971_p2 = scmp.eq.s32.totalorder %s6948_s16, 1 }
  0xfd   : > { %s7061_s23 = scalar_select %p6183_p0, 1, 0 }
  0xfe   : > { %s7060_s15 = scalar_select %p6179_p4, 1, 0 }
  0xff   : > { %p4924_p5 = scmp.lt.s32.totalorder %s5734_s11, 2  ;;  %s6191_s26 = sand.u32 1, %s5730_s10  }
 0x100   : > { %p6193_p7 = por %p971_p2, %p149_p12  ;;  %s6961_s2 = sshll.u32 %s6191_s26, 3 }
 0x101   : > { %s6954_s13 = sshll.u32 %s5734_s11, 7  ;;  %p6199_p10 = pnand %p4924_p5, %p145_p3 }
 0x102   : > { %s7062_s25 = scalar_select %p6193_p7, 1, 0 }
 0x103   : > { %s7064_s20 = scalar_select %p6199_p10, 1, 0 }
 0x104   : > { %7063 = sst [smem:[#allocation96_spill]] %s7062_s25  ;;  %s1383_s24 = sand.u32 1, %s5734_s11  }
 0x105   : > { %s6207_s16 = scalar_lea.hbm %s7046_s9, %s6954_s13  ;;  %s1387_s8 = scalar_lea.vmem [#allocation5], %s6961_s2 }
 0x106   : > { %s1394_s10 = sshll.u32 %s1387_s8, 4  ;;  %s6213_s1 = scalar_lea.sflag [#allocation6], %s1383_s24  ;;  %s6211_s10 = int_to_ptr.vmem [resolvable:$true] %s1394_s10 }
 0x107   : > { %s5170_s25 = scalar_lea.hbm %s6207_s16, 128  ;;  %p6219_p11 = pneg %p6199_p10 }
 0x108   : > { %p5171_p9 = scmp.ne.s32.totalorder %s6207_s16, %s5170_s25  ;;  %s5175_s13 = scalar_lea.hbm %s7046_s9, 256 }
 0x109   : > { %s7065_s0 = scalar_select %p6219_p11, 1, 0 }
 0x10a   : > { %p5173_p12 = pnand %p6219_p11, %p5171_p9  ;;  %p5176_p3 = scmp.lt.u32.totalorder %s6207_s16, %s7046_s9 }
 0x10b   : > { %p5177_p1 = scmp.lt.u32.totalorder %s5175_s13, %s5170_s25  ;;  %p5179_p5 = scmp.lt.u32.totalorder %s5170_s25, %s6207_s16 }
 0x10c   : > { %p5174_p13 = pneg %p5173_p12 }
 0x10d   : > { %p5178_p2 = por %p5177_p1, %p5176_p3 }
 0x10f   : > { %p5180_p7 = por %p5179_p5, %p5178_p2 }
 0x111   : > { %p5181_p0 = pnand %p5180_p7, %p5174_p13 }
 0x113   : > { %5184 = shalt.err (!%p5181_p0)
}
 0x114   : > { %s5185_s24 = scalar_lea.vmem %s6211_s10, 128  ;;  %s5788_s8 = smov [#allocation5]  }
 0x115   : > { %p5186_p4 = scmp.ne.s32.totalorder %s6211_s10, %s5185_s24  ;;  %s5190_s2 = sshll.u32 %s5788_s8, 4  ;;  %s5191_s2 = int_to_ptr.vmem [resolvable:$false] %s5190_s2 }
 0x116   : > { %s5192_s19 = scalar_lea.vmem %s5191_s2, 256  ;;  %p5193_p9 = scmp.lt.s32.totalorder %s6211_s10, %s5191_s2 }
 0x117   : > { %p5188_p6 = pnand %p5186_p4, %p6219_p11  ;;  %p5194_p12 = scmp.lt.s32.totalorder %s5192_s19, %s5185_s24 }
 0x119   : > { %p5189_p8 = pneg %p5188_p6  ;;  %p5195_p3 = por %p5194_p12, %p5193_p9 }
 0x11b   : > { %p5196_p1 = pnand %p5195_p3, %p5189_p8 }
 0x11d   : > { %5199 = shalt.err (!%p5196_p1)
}
 0x11e   : > { %4884 = dma.hbm_to_vmem [thread:$0]  (!%p6199_p10), %s6207_s16, 128, %s6211_s10, %s6213_s1  }
 0x11f   : > { %s5789_s13 = smov [#allocation10]   ;;  %s5790_s8 = smov [#allocation13]  }
 0x120   : > { %s1190_s25 = sshll.u32 %s5789_s13, 4  ;;  %s1214_s9 = sshll.u32 %s5790_s8, 4  ;;  %s1191_s25 = int_to_ptr.vmem [resolvable:$true] %s1190_s25  ;;  %s1215_s9 = int_to_ptr.vmem [resolvable:$true] %s1214_s9 }
 0x121   : > { %s5200_s2 = scalar_lea.hbm %s7045_s3, 16  ;;  %p7066_p4 = scmp.ne.s32.totalorder %s7056_s29, 0 }
 0x122   : > { %p5201_p6 = scmp.ne.s32.totalorder %s7045_s3, %s5200_s2  ;;  %p5207_p7 = scmp.lt.u32.totalorder %s5200_s2, %s7045_s3 }
 0x124   : > { %p5203_p8 = pnand %p5201_p6, %p7066_p4 }
 0x126   : > { %p5204_p0 = pneg %p5203_p8 }
 0x128   : > { %p5209_p13 = pnand %p5207_p7, %p5204_p0 }
 0x12a   : > { %5212 = shalt.err (!%p5209_p13)
}
 0x12b   : > { %s5213_s19 = scalar_lea.vmem %s1191_s25, 16  ;;  %s5220_s10 = scalar_lea.vmem %s1191_s25, 32 }
 0x12c   : > { %p5214_p2 = scmp.ne.s32.totalorder %s1191_s25, %s5213_s19  ;;  %p5221_p12 = scmp.lt.s32.totalorder %s1191_s25, %s1191_s25 }
 0x12d   : > { %p5222_p3 = scmp.lt.s32.totalorder %s5220_s10, %s5213_s19 }
 0x12e   : > { %p5216_p5 = pnand %p5214_p2, %p7066_p4 }
 0x12f   : > { %p5223_p1 = por %p5222_p3, %p5221_p12 }
 0x130   : > { %p5217_p9 = pneg %p5216_p5 }
 0x132   : > { %p5224_p10 = pnand %p5223_p1, %p5217_p9 }
 0x134   : > { %5227 = shalt.err (!%p5224_p10)
}
 0x135   : > { %p7067_p11 = scmp.ne.s32.totalorder %s7055_s28, 0  ;;  %s5228_s16 = scalar_lea.hbm %s7040_s14, 16 }
 0x136   : > { %p5229_p6 = scmp.ne.s32.totalorder %s7040_s14, %s5228_s16  ;;  %p5235_p7 = scmp.lt.u32.totalorder %s5228_s16, %s7040_s14 }
 0x137   : > { %4850 = dma.hbm_to_vmem [thread:$0]  (!%p7067_p11), %s7045_s3, 16, %s1191_s25, [#allocation9]  }
 0x138   : > { %p5231_p8 = pnand %p5229_p6, %p7066_p4 }
 0x13a   : > { %p5232_p0 = pneg %p5231_p8 }
 0x13c   : > { %p5237_p13 = pnand %p5235_p7, %p5232_p0 }
 0x13e   : > { %5240 = shalt.err (!%p5237_p13)
}
 0x13f   : > { %s5241_s24 = scalar_lea.vmem %s1215_s9, 16  ;;  %s5248_s13 = scalar_lea.vmem %s1215_s9, 32 }
 0x140   : > { %p5242_p10 = scmp.ne.s32.totalorder %s1215_s9, %s5241_s24  ;;  %p5249_p9 = scmp.lt.s32.totalorder %s1215_s9, %s1215_s9 }
 0x141   : > { %p5250_p12 = scmp.lt.s32.totalorder %s5248_s13, %s5241_s24 }
 0x142   : > { %p5244_p2 = pnand %p5242_p10, %p7066_p4 }
 0x143   : > { %p5251_p3 = por %p5250_p12, %p5249_p9 }
 0x144   : > { %p5245_p5 = pneg %p5244_p2 }
 0x146   : > { %p5252_p1 = pnand %p5251_p3, %p5245_p5 }
 0x148   : > { %5255 = shalt.err (!%p5252_p1)
}
 0x149   : > { %4856 = dma.hbm_to_vmem [thread:$0]  (!%p7067_p11), %s7040_s14, 16, %s1215_s9, [#allocation12]  }
 0x14a   : > { %s5791_s25 = smov [#allocation16]   ;;  %s5792_s2 = smov [#allocation19]  }
 0x14b   : > { %s1242_s8 = sshll.u32 %s5791_s25, 4  ;;  %s1270_s19 = sshll.u32 %s5792_s2, 4  ;;  %s1243_s8 = int_to_ptr.vmem [resolvable:$true] %s1242_s8  ;;  %s1271_s19 = int_to_ptr.vmem [resolvable:$true] %s1270_s19 }
 0x14c   : > { %s5256_s10 = scalar_lea.hbm %s7042_s6, 16 }
 0x14d   : > { %p5257_p6 = scmp.ne.s32.totalorder %s7042_s6, %s5256_s10  ;;  %p5263_p7 = scmp.lt.u32.totalorder %s5256_s10, %s7042_s6 }
 0x14f   : > { %p5259_p8 = pnand %p5257_p6, %p7066_p4 }
 0x151   : > { %p5260_p0 = pneg %p5259_p8 }
 0x153   : > { %p5265_p13 = pnand %p5263_p7, %p5260_p0 }
 0x155   : > { %5268 = shalt.err (!%p5265_p13)
}
 0x156   : > { %s5269_s16 = scalar_lea.vmem %s1243_s8, 16  ;;  %s5276_s9 = scalar_lea.vmem %s1243_s8, 32 }
 0x157   : > { %p5270_p10 = scmp.ne.s32.totalorder %s1243_s8, %s5269_s16  ;;  %p5277_p9 = scmp.lt.s32.totalorder %s1243_s8, %s1243_s8 }
 0x158   : > { %p5278_p12 = scmp.lt.s32.totalorder %s5276_s9, %s5269_s16 }
 0x159   : > { %p5272_p2 = pnand %p5270_p10, %p7066_p4 }
 0x15a   : > { %p5279_p3 = por %p5278_p12, %p5277_p9 }
 0x15b   : > { %p5273_p5 = pneg %p5272_p2 }
 0x15d   : > { %p5280_p1 = pnand %p5279_p3, %p5273_p5 }
 0x15f   : > { %5283 = shalt.err (!%p5280_p1)
}
 0x160   : > { %4862 = dma.hbm_to_vmem [thread:$0]  (!%p7067_p11), %s7042_s6, 16, %s1243_s8, [#allocation15]  }
 0x161   : > { %s5284_s24 = scalar_lea.hbm %s7044_s4, 16 }
 0x162   : > { %p5285_p6 = scmp.ne.s32.totalorder %s7044_s4, %s5284_s24  ;;  %p5291_p7 = scmp.lt.u32.totalorder %s5284_s24, %s7044_s4 }
 0x164   : > { %p5287_p8 = pnand %p5285_p6, %p7066_p4 }
 0x166   : > { %p5288_p0 = pneg %p5287_p8 }
 0x168   : > { %p5293_p13 = pnand %p5291_p7, %p5288_p0 }
 0x16a   : > { %5296 = shalt.err (!%p5293_p13)
}
 0x16b   : > { %s5297_s13 = scalar_lea.vmem %s1271_s19, 16  ;;  %s5304_s25 = scalar_lea.vmem %s1271_s19, 32 }
 0x16c   : > { %p5298_p10 = scmp.ne.s32.totalorder %s1271_s19, %s5297_s13  ;;  %p5305_p9 = scmp.lt.s32.totalorder %s1271_s19, %s1271_s19 }
 0x16d   : > { %p5306_p12 = scmp.lt.s32.totalorder %s5304_s25, %s5297_s13 }
 0x16e   : > { %p5300_p2 = pnand %p5298_p10, %p7066_p4 }
 0x16f   : > { %p5307_p3 = por %p5306_p12, %p5305_p9 }
 0x170   : > { %p5301_p5 = pneg %p5300_p2 }
 0x172   : > { %p5308_p1 = pnand %p5307_p3, %p5301_p5 }
 0x174   : > { %5311 = shalt.err (!%p5308_p1)
}
 0x175   : > { %4868 = dma.hbm_to_vmem [thread:$0]  (!%p7067_p11), %s7044_s4, 16, %s1271_s19, [#allocation18]  }
 0x176   : > { %s5793_s8 = smov [#allocation22]   ;;  %s5794_s10 = smov [#allocation23]  }
 0x177   : > { %s1307_s2 = sshll.u32 %s5793_s8, 4  ;;  %s1321_s16 = sshll.u32 %s5794_s10, 4  ;;  %s1308_s2 = int_to_ptr.vmem [resolvable:$true] %s1307_s2  ;;  %s1322_s16 = int_to_ptr.vmem [resolvable:$true] %s1321_s16 }
 0x178   : > { %s5312_s9 = scalar_lea.hbm %s5936_s27, 16 }
 0x179   : > { %p5313_p6 = scmp.ne.s32.totalorder %s5936_s27, %s5312_s9  ;;  %p5319_p7 = scmp.lt.u32.totalorder %s5312_s9, %s5936_s27 }
 0x17b   : > { %p5315_p8 = pnand %p5313_p6, %p7066_p4 }
 0x17d   : > { %p5316_p0 = pneg %p5315_p8 }
 0x17f   : > { %p5321_p13 = pnand %p5319_p7, %p5316_p0 }
 0x181   : > { %5324 = shalt.err (!%p5321_p13)
}
 0x182   : > { %s5325_s24 = scalar_lea.vmem %s1308_s2, 16  ;;  %s5332_s19 = scalar_lea.vmem %s1308_s2, 32 }
 0x183   : > { %p5326_p10 = scmp.ne.s32.totalorder %s1308_s2, %s5325_s24  ;;  %p5333_p9 = scmp.lt.s32.totalorder %s1308_s2, %s1308_s2 }
 0x184   : > { %p5334_p12 = scmp.lt.s32.totalorder %s5332_s19, %s5325_s24 }
 0x185   : > { %p5328_p2 = pnand %p5326_p10, %p7066_p4 }
 0x186   : > { %p5335_p3 = por %p5334_p12, %p5333_p9 }
 0x187   : > { %p5329_p5 = pneg %p5328_p2 }
 0x189   : > { %p5336_p1 = pnand %p5335_p3, %p5329_p5 }
 0x18b   : > { %5339 = shalt.err (!%p5336_p1)
}
 0x18c   : > { %4874 = dma.hbm_to_vmem [thread:$0]  (!%p7067_p11), %s5936_s27, 16, %s1308_s2, [#allocation21]  }
 0x18d   : > { %s5340_s13 = scalar_lea.hbm %s7041_s12, 16 }
 0x18e   : > { %p5341_p6 = scmp.ne.s32.totalorder %s7041_s12, %s5340_s13  ;;  %p5347_p7 = scmp.lt.u32.totalorder %s5340_s13, %s7041_s12 }
 0x190   : > { %p5343_p8 = pnand %p5341_p6, %p7066_p4 }
 0x192   : > { %p5344_p0 = pneg %p5343_p8 }
 0x194   : > { %p5349_p13 = pnand %p5347_p7, %p5344_p0 }
 0x196   : > { %5352 = shalt.err (!%p5349_p13)
}
 0x197   : > { %s5353_s25 = scalar_lea.vmem %s1322_s16, 16  ;;  %s5360_s8 = scalar_lea.vmem %s1322_s16, 32 }
 0x198   : > { %p5354_p10 = scmp.ne.s32.totalorder %s1322_s16, %s5353_s25  ;;  %p5361_p9 = scmp.lt.s32.totalorder %s1322_s16, %s1322_s16 }
 0x199   : > { %p5362_p12 = scmp.lt.s32.totalorder %s5360_s8, %s5353_s25 }
 0x19a   : > { %p5356_p2 = pnand %p5354_p10, %p7066_p4 }
 0x19b   : > { %p5363_p3 = por %p5362_p12, %p5361_p9 }
 0x19c   : > { %p5357_p5 = pneg %p5356_p2 }
 0x19e   : > { %p5364_p1 = pnand %p5363_p3, %p5357_p5 }
 0x1a0   : > { %5367 = shalt.err (!%p5364_p1)
}
 0x1a1   : > { %4877 = dma.hbm_to_vmem [thread:$0]  (!%p7067_p11), %s7041_s12, 16, %s1322_s16, [#allocation24]  }
 0x1a2   : > { %s7068_s29 = sshll.u32 %s5734_s11, 7  ;;  %s7069_s10 = sshll.u32 %s6191_s26, 3 }
 0x1a3   : > { %s6302_s2 = scalar_lea.hbm %s7043_s5, %s7068_s29  ;;  %s1369_s9 = scalar_lea.vmem [#allocation2], %s7069_s10 }
 0x1a4   : > { %s1376_s28 = sshll.u32 %s1369_s9, 4  ;;  %s4144_s24 = sshll.u32 %s5734_s11, 4  ;;  %s6306_s28 = int_to_ptr.vmem [resolvable:$true] %s1376_s28 }
 0x1a5   : > { %s1366_s19 = scalar_lea.sflag [#allocation3], %s6191_s26  ;;  %s5368_s13 = scalar_lea.hbm %s6302_s2, 128 }
 0x1a6   : > { %p5369_p4 = scmp.ne.s32.totalorder %s6302_s2, %s5368_s13  ;;  %p7070_p6 = scmp.ne.s32.totalorder %s7065_s0, 0 }
 0x1a7   : > { %s5373_s16 = scalar_lea.hbm %s7043_s5, 256  ;;  %p5374_p11 = scmp.lt.u32.totalorder %s6302_s2, %s7043_s5 }
 0x1a8   : > { %p5371_p8 = pnand %p5369_p4, %p7070_p6  ;;  %p5375_p7 = scmp.lt.u32.totalorder %s5373_s16, %s5368_s13 }
 0x1a9   : > { %p5377_p10 = scmp.lt.u32.totalorder %s5368_s13, %s6302_s2 }
 0x1aa   : > { %p5372_p0 = pneg %p5371_p8  ;;  %p5376_p13 = por %p5375_p7, %p5374_p11 }
 0x1ac   : > { %p5378_p2 = por %p5377_p10, %p5376_p13 }
 0x1ae   : > { %p5379_p5 = pnand %p5378_p2, %p5372_p0 }
 0x1b0   : > { %5382 = shalt.err (!%p5379_p5)
}
 0x1b1   : > { %s5383_s25 = scalar_lea.vmem %s6306_s28, 128  ;;  %s5795_s8 = smov [#allocation2]  }
 0x1b2   : > { %p5384_p9 = scmp.ne.s32.totalorder %s6306_s28, %s5383_s25  ;;  %s5388_s29 = sshll.u32 %s5795_s8, 4  ;;  %s5389_s29 = int_to_ptr.vmem [resolvable:$false] %s5388_s29 }
 0x1b3   : > { %s5390_s10 = scalar_lea.vmem %s5389_s29, 256  ;;  %p5391_p1 = scmp.lt.s32.totalorder %s6306_s28, %s5389_s29 }
 0x1b4   : > { %p5386_p12 = pnand %p5384_p9, %p7070_p6  ;;  %p5392_p4 = scmp.lt.s32.totalorder %s5390_s10, %s5383_s25 }
 0x1b6   : > { %p5387_p3 = pneg %p5386_p12  ;;  %p5393_p8 = por %p5392_p4, %p5391_p1 }
 0x1b8   : > { %p5394_p11 = pnand %p5393_p8, %p5387_p3 }
 0x1ba   : > { %5397 = shalt.err (!%p5394_p11)
}
 0x1bb   : > { %p7071_p0 = scmp.ne.s32.totalorder %s7064_s20, 0  ;;  %s6330_s9 = scalar_lea.hbm %s5831_s17, %s4144_s24 }
 0x1bc   : > { %s1410_s13 = scalar_lea.vmem [#allocation7], %s6191_s26  ;;  %s5398_s25 = scalar_lea.hbm %s6330_s9, 16 }
 0x1bd   : > { %4881 = dma.hbm_to_vmem [thread:$0]  (!%p7071_p0), %s6302_s2, 128, %s6306_s28, %s1366_s19  }
 0x1be   : > { %s1417_s16 = sshll.u32 %s1410_s13, 4  ;;  %p5399_p7 = scmp.ne.s32.totalorder %s6330_s9, %s5398_s25  ;;  %s1418_s16 = int_to_ptr.vmem [resolvable:$true] %s1417_s16 }
 0x1bf   : > { %s5403_s8 = scalar_lea.hbm %s5831_s17, 32  ;;  %p5404_p2 = scmp.lt.u32.totalorder %s6330_s9, %s5831_s17 }
 0x1c0   : > { %p5401_p13 = pnand %p5399_p7, %p7070_p6  ;;  %p5405_p5 = scmp.lt.u32.totalorder %s5403_s8, %s5398_s25 }
 0x1c1   : > { %p5407_p12 = scmp.lt.u32.totalorder %s5398_s25, %s6330_s9 }
 0x1c2   : > { %p5402_p10 = pneg %p5401_p13  ;;  %p5406_p9 = por %p5405_p5, %p5404_p2 }
 0x1c4   : > { %p5408_p3 = por %p5407_p12, %p5406_p9 }
 0x1c6   : > { %p5409_p1 = pnand %p5408_p3, %p5402_p10 }
 0x1c8   : > { %5412 = shalt.err (!%p5409_p1)
}
 0x1c9   : > { %s5413_s2 = scalar_lea.vmem %s1418_s16, 16  ;;  %s5796_s26 = smov [#allocation7]  }
 0x1ca   : > { %p5414_p4 = scmp.ne.s32.totalorder %s1418_s16, %s5413_s2  ;;  %s5418_s28 = sshll.u32 %s5796_s26, 4  ;;  %s5419_s28 = int_to_ptr.vmem [resolvable:$false] %s5418_s28 }
 0x1cb   : > { %s5420_s24 = scalar_lea.vmem %s5419_s28, 32  ;;  %p5421_p7 = scmp.lt.s32.totalorder %s1418_s16, %s5419_s28 }
 0x1cc   : > { %p5416_p8 = pnand %p5414_p4, %p7070_p6  ;;  %p5422_p13 = scmp.lt.s32.totalorder %s5420_s24, %s5413_s2 }
 0x1ce   : > { %p5417_p11 = pneg %p5416_p8  ;;  %p5423_p0 = por %p5422_p13, %p5421_p7 }
 0x1d0   : > { %p5424_p2 = pnand %p5423_p0, %p5417_p11 }
 0x1d2   : > { %5427 = shalt.err (!%p5424_p2)
}
 0x1d3   : > { %p7072_p5 = scmp.ne.s32.totalorder %s7064_s20, 0  ;;  %p7073_p10 = scmp.ne.s32.totalorder %s7054_s22, 0 }
 0x1d4   : > { %s6350_s0 = sand.u32 (!%p7073_p10), 1, %s5726_s7   ;;  %p7074_p6 = scmp.ne.s32.totalorder (!%p7073_p10), %s7060_s15, 0 }
 0x1d5   : > { %4887 = dma.hbm_to_vmem [thread:$0]  (!%p7072_p5), %s6330_s9, 16, %s1418_s16, %s6213_s1  }
 0x1d6   : > { %1426 = sbr.rel (%p7073_p10) target bundleno = 2555 (0x9fb), region = 172  ;;  %s6353_s19 = sshll.u32 (!%p7073_p10), %s6350_s0, 3 }
 0x1d7   : > { %s1429_s29 = scalar_lea.sflag (!%p7073_p10), [#allocation3], %s6350_s0  ;;  %s1432_s10 = scalar_lea.vmem (!%p7073_p10), [#allocation2], %s6353_s19 }
 0x1dd   : > { %5669 = dma.done.wait (%p7074_p6), %s1429_s29, 128  }
 0x1de   : > { %5671 = vsyncadd (%p7074_p6), %s1429_s29, 4294967168  ;;  %s6362_s20 = sand.u32 1, %s6064_s18   ;;  %s1441_s1 = scalar_lea.vmem [#allocation5], %s6353_s19 }
 0x1df   : > { %s1438_s22 = scalar_lea.sflag [#allocation6], %s6362_s20 }
 0x1e0   : > { %5673 = dma.done.wait (%p7074_p6), %s1438_s22, 144  }
 0x1e1   : > { %5675 = vsyncadd (%p7074_p6), %s1438_s22, 4294967152  ;;  %s1449_s9 = scalar_lea.vmem [#allocation7], %s6350_s0  ;;  %p7075_p0 = scmp.eq.s32.totalorder %s6064_s18, 0 }
 0x1e3   : > { %5677 = dma.done.wait (%p7075_p0), [#allocation9], 32   ;;  %p7076_p9 = pmov %p7075_p0 }
 0x1e4   : > { %p7077_p12 = pmov %p7075_p0 }
 0x1e5   : > { %5679 = vsyncadd (%p7076_p9), [#allocation9], 4294967264 }
 0x1e6   : > { %5681 = dma.done.wait (%p7077_p12), [#allocation12], 400   ;;  %p7078_p3 = pmov %p7075_p0 }
 0x1e7   : > { %p7079_p1 = pmov %p7075_p0 }
 0x1e8   : > { %5683 = vsyncadd (%p7078_p3), [#allocation12], 4294966896 }
 0x1e9   : > { %5685 = dma.done.wait (%p7079_p1), [#allocation15], 32   ;;  %p7080_p4 = pmov %p7075_p0 }
 0x1ea   : > { %p7081_p8 = pmov %p7075_p0 }
 0x1eb   : > { %5687 = vsyncadd (%p7080_p4), [#allocation15], 4294967264 }
 0x1ec   : > { %5689 = dma.done.wait (%p7081_p8), [#allocation18], 32   ;;  %p7082_p11 = pmov %p7075_p0 }
 0x1ed   : > { %p7083_p7 = pmov %p7075_p0 }
 0x1ee   : > { %5691 = vsyncadd (%p7082_p11), [#allocation18], 4294967264 }
 0x1ef   : > { %5693 = dma.done.wait (%p7083_p7), [#allocation21], 32   ;;  %p7084_p13 = pmov %p7075_p0 }
 0x1f0   : > { %p7085_p2 = pmov %p7075_p0 }
 0x1f1   : > { %5695 = vsyncadd (%p7084_p13), [#allocation21], 4294967264 }
 0x1f2   : > { %5697 = dma.done.wait (%p7085_p2), [#allocation24], 16   ;;  %p7086_p5 = pmov %p7075_p0 }
 0x1f3   : > { %s7087_s15 = sld [smem:[#allocation53_spill]]  ;;  %s7088_s13 = sld [smem:[#allocation55_spill]]  ;;  %v5797_v0 = vmov 0.0|0.0   ;;  %vm5798_vm0 = vmmov 0   ;;  %v5799_v1 = vmov 0.0   ;;  %v1648_v12 = vld [vmem:[%s1432_s10] sm:$0xff] }
 0x1f4   : > { %5699 = vsyncadd (%p7086_p5), [#allocation24], 4294967280  ;;  %4623 = vmatprep.subr.bf16.mxu0 %v5797_v0  ;;  %4359 = vmatprep.mubr.msk.f32.mxu0 %vm5798_vm0, %v5799_v1  ;;  %vm1664_vm1 = vcmask 326656   ;;  %v4165_v16 = vld [vmem:[#allocation8] ss:$0 sm:$0xff]  ;;  %v1824_v17 = vld [vmem:[#allocation11] sm:$0xff] }
 0x1f5   : > { %4629 = vmatprep.subr.bf16.mxu1 %v5797_v0  ;;  %4370 = vmatprep.mubr.msk.f32.mxu1 %vm5798_vm0, %v5799_v1  ;;  %v1825_v18 = vld [vmem:[#allocation11 + $0x8] sm:$0xff]  ;;  %s7089_s16 = sld [smem:[#allocation59_spill]]  ;;  %vm1750_vm2 = vcmask 261120   ;;  %s7090_s25 = sld [smem:[#allocation61_spill]]  ;;  %v1826_v24 = vld [vmem:[#allocation11 + $0x10] sm:$0xff]  ;;  %vm1834_vm3 = vcmask 195584  }
 0x1f6   : > { %v4636_v22 = vpack.c.bf16 %v1825_v18, %v1824_v17  ;;  %v1649_v25 = vld [vmem:[%s1441_s1] sm:$0xff]  ;;  %s7091_s8 = sld [smem:[#allocation65_spill]]  ;;  %s7092_s2 = sld [smem:[#allocation52_spill]]  ;;  %v4167_v41 = vld [vmem:[#allocation10] ss:$0 sm:$0xff]  ;;  %vm2548_vm4 = vcmask 523264  }
 0x1f7   : > { %p1645_p10 = scmp.lt.s32.totalorder %s6064_s18, 1  ;;  %s6968_s24 = scalar_lea.vmem [#allocation25], %s6353_s19  ;;  %v4169_v46 = vld [vmem:[#allocation13] ss:$0 sm:$0xff]  ;;  %v4173_v63 = vld [vmem:[#allocation16] ss:$0 sm:$0xff] }
 0x1f8   : > { %s7093_s29 = sld [smem:[#allocation63_spill]]  ;;  %s7094_s10 = sld [smem:[#allocation67_spill]]  ;;  %vm3425_vm5 = vcmask 40960  }
 0x1f9   : > { %v1652_v2 = vld [vmem:[%s7087_s15] sm:$0xff]  ;;  %v1653_v3 = vld [vmem:[%s7087_s15 + $0x8] sm:$0xff]  ;;  %v1654_v4 = vld [vmem:[%s7087_s15 + $0x10] sm:$0xff]  ;;  %s1646_s26 = scalar_select %p1645_p10, %s6064_s18, 1 }
 0x1fa   : > { %v4624_v5 = vpack.c.bf16 %v1653_v3, %v1652_v2  ;;  %v1655_v6 = vld [vmem:[%s7087_s15 + $0x18] sm:$0xff]  ;;  %v1739_v7 = vld [vmem:[%s7088_s13] sm:$0xff]  ;;  %v1740_v8 = vld [vmem:[%s7088_s13 + $0x8] sm:$0xff]  ;;  %s7096_s1 = sld [smem:[#allocation69_spill]]  ;;  %s6976_s4 = scalar_lea.vmem [#allocation29], %s6353_s19 }
 0x1fb   : > { %v4627_v9 = vpack.c.bf16 %v1655_v6, %v1654_v4  ;;  %v4630_v10 = vpack.c.bf16 %v1740_v8, %v1739_v7  ;;  %v1656_v11 = vld [vmem:[%s7087_s15 + $0x20] sm:$0xff]  ;;  %v1741_v13 = vld [vmem:[%s7088_s13 + $0x10] sm:$0xff]  ;;  %v1742_v14 = vld [vmem:[%s7088_s13 + $0x18] sm:$0xff]  ;;  %s7117_s6 = scalar_lea.vmem [#allocation26], %s6353_s19  ;;  %p7118_p0 = scmp.ne.s32.totalorder %s7061_s23, 0 }
 0x1fc   : > { %4625 = vmatpush3.bf16.msra.mxu0 %v4624_v5  ;;  %v4633_v15 = vpack.c.bf16 %v1742_v14, %v1741_v13  ;;  %v1909_v26 = vld [vmem:[%s7089_s16] sm:$0xff]  ;;  %v1910_v27 = vld [vmem:[%s7089_s16 + $0x8] sm:$0xff]  ;;  %v1911_v29 = vld [vmem:[%s7089_s16 + $0x10] sm:$0xff]  ;;  %s1647_s28 = scalar_lea.vmem %s7092_s2, %s1646_s26  ;;  %s6969_s2 = scalar_lea.vmem [#allocation26], %s6353_s19 }
 0x1fd   : > { %4626 = vmatprep.subr.bf16.mxu0 %v5797_v0  ;;  %4631 = vmatpush3.bf16.msra.mxu1 %v4630_v10  ;;  %v4639_v28 = vpack.c.bf16 %v1910_v27, %v1909_v26  ;;  %v1912_v30 = vld [vmem:[%s7089_s16 + $0x18] sm:$0xff]  ;;  %v1993_v32 = vld [vmem:[%s7090_s25] sm:$0xff]  ;;  %v1994_v33 = vld [vmem:[%s7090_s25 + $0x8] sm:$0xff]  ;;  %s7098_s26 = sld [smem:[#allocation70_spill]] }
 0x1fe   : > { %4632 = vmatprep.subr.bf16.mxu1 %v5797_v0  ;;  %v4642_v31 = vpack.c.bf16 %v1912_v30, %v1911_v29  ;;  %v1995_v34 = vld [vmem:[%s7090_s25 + $0x10] sm:$0xff]  ;;  %v4644_v35 = vpack.c.bf16 %v1994_v33, %v1993_v32  ;;  %v1996_v36 = vld [vmem:[%s7090_s25 + $0x18] sm:$0xff]  ;;  %v2179_v38 = vld [vmem:[%s7091_s8] sm:$0xff]  ;;  %s7095_s22 = smov %s7094_s10 }
 0x1ff   : > { %v4648_v37 = vpack.c.bf16 %v1996_v36, %v1995_v34  ;;  %v2180_v39 = vld [vmem:[%s7091_s8 + $0x8] sm:$0xff]  ;;  %v1650_v45 = vld [vmem:[%s1647_s28] sm:$0x1]  ;;  %v2181_v51 = vld [vmem:[%s7091_s8 + $0x10] sm:$0xff]  ;;  %s7099_s28 = sld [smem:[#allocation76_spill]] }
 0x200   : > { %4628 = vmatpush3.bf16.msra.mxu0 %v4627_v9  ;;  %v4660_v40 = vpack.c.bf16 %v2180_v39, %v2179_v38  ;;  %v2182_v52 = vld [vmem:[%s7091_s8 + $0x18] sm:$0xff]  ;;  %v2087_v54 = vld [vmem:[%s7093_s29] sm:$0xff]  ;;  %v2088_v55 = vld [vmem:[%s7093_s29 + $0x8] sm:$0xff]  ;;  %s3572_s8 = sshll.u32 %s7117_s6, 4  ;;  %s3573_s8 = int_to_ptr.vmem [resolvable:$true] %s3572_s8 }
 0x201   : > { %4357 = vmatprep.subr.mxu0 %v5799_v1  ;;  %4634 = vmatpush3.bf16.msra.mxu1 %v4633_v15  ;;  %v4664_v53 = vpack.c.bf16 %v2182_v52, %v2181_v51  ;;  %v4652_v56 = vpack.c.bf16 %v2088_v55, %v2087_v54  ;;  %v2089_v57 = vld [vmem:[%s7093_s29 + $0x10] sm:$0xff]  ;;  %v2090_v58 = vld [vmem:[%s7093_s29 + $0x18] sm:$0xff]  ;;  %v2273_v60 = vld [vmem:[%s7094_s10] sm:$0xff]  ;;  %s7100_s10 = sld [smem:[#allocation73_spill]]  ;;  %s5428_s12 = scalar_lea.vmem %s3573_s8, 128 }
 0x202   : > { %4635 = vmatprep.subr.bf16.mxu1 %v5797_v0  ;;  %v4656_v59 = vpack.c.bf16 %v2090_v58, %v2089_v57  ;;  %v2274_v61 = vld [vmem:[%s7095_s22 + $0x8] sm:$0xff]  ;;  %v4171_v8 = vld [vmem:[#allocation14] ss:$0 sm:$0xff]  ;;  %v2275_v13 = vld [vmem:[%s7095_s22 + $0x10] sm:$0xff]  ;;  %p5429_p6 = scmp.ne.s32.totalorder %s3573_s8, %s5428_s12 }
 0x203   : > { %v4668_v62 = vpack.c.bf16 %v2274_v61, %v2273_v60  ;;  %v2276_v14 = vld [vmem:[%s7095_s22 + $0x18] sm:$0xff]  ;;  %v2366_v17 = vld [vmem:[%s7096_s1 + $0x8] sm:$0xff]  ;;  %v2367_v18 = vld [vmem:[%s7096_s1 + $0x10] sm:$0xff] }
 0x204   : > { %4358 = vmatpush3.msra.mxu0 %v1656_v11  ;;  %v4672_v15 = vpack.c.bf16 %v2276_v14, %v2275_v13  ;;  %v4179_v30 = vld [vmem:[#allocation19] ss:$0 sm:$0xff]  ;;  %v2444_v36 = vld [vmem:[%s7098_s26 + $0x8] sm:$0xff]  ;;  %p5430_p9 = pnand %p5429_p6, %p7118_p0 }
 0x205   : > { %4360 = vmatmul.mubr.msk.f32.vlgmr.msra.gmra.mrb[0].mxu0 %vm1664_vm1, %v1648_v12  ;;  %4638 = vmatprep.subr.bf16.mxu0 %v5797_v0  ;;  %v1651_v12 = vld [vmem:[%s1449_s9] sm:$0x1]  ;;  %s7097_s9 = sld [smem:[#allocation75_spill]]  ;;  %v2700_v55 = vld [vmem:[%s7099_s28 + $0x10] sm:$0xff] }
 0x206   : > { %4390 = vmatprep.mubr.msk.f32.mxu0 %vm5798_vm0, %v5799_v1  ;;  %4640 = vmatpush3.bf16.msra.mxu0 %v4639_v28  ;;  %p5431_p12 = pneg %p5430_p9 }
 0x207   : > { %4641 = vmatprep.subr.bf16.mxu0 %v5797_v0 }
 0x20a   : > { %4643 = vmatpush3.bf16.msra.mxu0 %v4642_v31 }
 0x20b   : > { %4653 = vmatprep.subr.bf16.mxu0 %v4652_v56 }
 0x2d8   : > { %v1734_v19 = vpop.f32.mrb[0].mxu0 }
 0x2d9   : > { %v1735_v20 = vadd.f32 %v4165_v16, %v1734_v19  ;;  %v4361_v21 = vpop.f32.mrb[1].mxu0  ;;  %v2365_v16 = vld [vmem:[%s7096_s1] sm:$0xff] }
 0x2da   : > { %v4677_v19 = vpack.c.bf16 %v2366_v17, %v2365_v16 }
 0x2db   : > { %v1738_v23 = vmax.f32 %v1735_v20, 0.0  ;;  %v2368_v20 = vld [vmem:[%s7096_s1 + $0x18] sm:$0xff] }
 0x2dc   : > { %v4680_v21 = vpack.c.bf16 %v2368_v20, %v2367_v18 }
 0x2dd   : > { %4371 = vmatmul.mubr.msk.f32.vlgmr.msra.gmra.mrb[0].mxu1 %vm1750_vm2, %v1738_v23  ;;  %v2622_v23 = vld [vmem:[%s7097_s9] sm:$0xff] }
 0x2de   : > { %4637 = vmatpush3.bf16.msra.mxu1 %v4636_v22  ;;  %4379 = vmatprep.mubr.msk.f32.mxu1 %vm5798_vm0, %v5799_v1  ;;  %v2369_v22 = vld [vmem:[%s7096_s1 + $0x20] sm:$0xff]  ;;  %s7104_s1 = sld [smem:[#allocation79_spill]] }
 0x2df   : > { %4377 = vmatprep.subr.mxu1 %v5799_v1 }
 0x2e2   : > { %4378 = vmatpush3.msra.mxu1 %v1826_v24  ;;  %v2623_v24 = vld [vmem:[%s7097_s9 + $0x8] sm:$0xff] }
 0x2e3   : > { %4380 = vmatmul.mubr.msk.f32.vlgmr.msra.gmra.mrb[2].mxu1 %vm1834_vm3, %v1649_v25  ;;  %4645 = vmatprep.subr.bf16.mxu1 %v4644_v35  ;;  %v4176_v25 = vld [vmem:[#allocation17] ss:$0 sm:$0xff]  ;;  %v4698_v27 = vpack.c.bf16 %v2623_v24, %v2622_v23 }
 0x2e4   : > { %4647 = vmatpush3.bf16.msra.mxu1 %v4644_v35  ;;  %v2443_v35 = vld [vmem:[%s7098_s26] sm:$0xff] }
 0x2e5   : > { %4649 = vmatprep.subr.bf16.mxu1 %v4648_v37  ;;  %v4683_v39 = vpack.c.bf16 %v2444_v36, %v2443_v35  ;;  %v6565_v36 = vld [vmem:[%s7104_s1] ss:$0 sm:$0xff]  ;;  %s7107_s1 = sld [smem:[#allocation71_spill]] }
 0x2e8   : > { %4651 = vmatpush3.bf16.msra.mxu1 %v4648_v37 }
 0x2e9   : > { %4661 = vmatprep.subr.bf16.mxu1 %v4660_v40 }
 0x3b0   : > { %v1820_v42 = vpop.f32.mrb[0].mxu1 }
 0x3b1   : > { %v6441_v43 = vadd.f32 %v4167_v41, %v1820_v42  ;;  %v4372_v44 = vpop.f32.mrb[1].mxu1  ;;  %v2624_v41 = vld [vmem:[%s7097_s9 + $0x10] sm:$0xff]  ;;  %s6993_s9 = scalar_lea.sflag [#allocation27], %s6362_s20 }
 0x3b2   : > { %v2445_v42 = vld [vmem:[%s7098_s26 + $0x10] sm:$0xff] }
 0x3b3   : > { %4401 = vmatprep.mubr.msk.f32.mxu1 %vm1750_vm2, %v6441_v43  ;;  %3506 = vst.msk [vmem:[%s6968_s24] sm:$0xff] %vm1750_vm2, %v6441_v43  ;;  %s7101_s24 = smov %s7100_s10 }
 0x3b4   : > { %4402 = vmatmul.mubr.msk.f32.vlgmr.msra.gmra.mrb[4].mxu1 %vm1750_vm2, %v1650_v45  ;;  %v2536_v60 = vld [vmem:[%s7101_s24 + $0x18] sm:$0xff] }
 0x3b5   : > { %4663 = vmatpush3.bf16.msra.mxu1 %v4660_v40 }
 0x3b6   : > { %v1904_v47 = vpop.f32.mrb[2].mxu1  ;;  %4665 = vmatprep.subr.bf16.mxu1 %v4664_v53 }
 0x3b7   : > { %v1905_v48 = vadd.f32 %v4169_v46, %v1904_v47  ;;  %v4381_v49 = vpop.f32.mrb[3].mxu1  ;;  %v2698_v46 = vld [vmem:[%s7099_s28] sm:$0xff]  ;;  %v2699_v47 = vld [vmem:[%s7099_s28 + $0x8] sm:$0xff] }
 0x3b8   : > { %v2533_v49 = vld [vmem:[%s7100_s10] sm:$0xff]  ;;  %v4701_v52 = vpack.c.bf16 %v2699_v47, %v2698_v46  ;;  %s7102_s10 = sld [smem:[#allocation80_spill]]  ;;  %v6589_v47 = vld [vmem:[#allocation23] ss:$0 sm:$0xff] }
 0x3b9   : > { %v1908_v50 = vmax.f32 %v1905_v48, 0.0  ;;  %4667 = vmatpush3.bf16.msra.mxu1 %v4664_v53  ;;  %v4182_v48 = vld [vmem:[#allocation20] ss:$0 sm:$0xff] }
 0x3ba   : > { %4676 = vmatprep.subr.bf16.mxu1 %v5797_v0 }
 0x3bb   : > { %4391 = vmatmul.mubr.msk.f32.vlgmr.msra.gmra.mrb[2].mxu0 %vm1750_vm2, %v1908_v50  ;;  %v2534_v50 = vld [vmem:[%s7101_s24 + $0x8] sm:$0xff] }
 0x3bc   : > { %4655 = vmatpush3.bf16.msra.mxu0 %v4652_v56  ;;  %v2701_v56 = vld [vmem:[%s7099_s28 + $0x18] sm:$0xff]  ;;  %v6511_v58 = vpack.c.bf16 %v2534_v50, %v2533_v49 }
 0x3bd   : > { %4657 = vmatprep.subr.bf16.mxu0 %v4656_v59  ;;  %v4704_v61 = vpack.c.bf16 %v2701_v56, %v2700_v55 }
 0x3c0   : > { %4659 = vmatpush3.bf16.msra.mxu0 %v4656_v59  ;;  %v2535_v59 = vld [vmem:[%s7101_s24 + $0x10] sm:$0xff] }
 0x3c1   : > { %4669 = vmatprep.subr.bf16.mxu0 %v4668_v62 }
 0x487   : > { %v4403_v2 = vpop.f32.mrb[4].mxu1 }
 0x488   : > { %v2082_v3 = vadd.f32 %v4403_v2, %v4173_v63  ;;  %v2076_v4 = vpop.f32.mrb[5].mxu1  ;;  %v2538_v2 = vld [vmem:[%s7101_s24 + $0x28] sm:$0xff] }
 0x489   : > { %v2077_v5 = vadd.f32 %v4173_v63, %v2076_v4  ;;  %v2537_v63 = vld [vmem:[%s7101_s24 + $0x20] sm:$0xff] }
 0x48a   : > { %v2086_v6 = vmax.f32 %v2082_v3, 0.0  ;;  %v2702_v3 = vld [vmem:[%s7099_s28 + $0x20] sm:$0xff]  ;;  %v4692_v4 = vpack.c.bf16 %v2538_v2, %v2537_v63  ;;  %v3330_v63 = vsel %vm1750_vm2, %v6441_v43, 0.0 }
 0x48b   : > { %v2085_v7 = vmax.f32 %v2077_v5, 0.0  ;;  %v2539_v5 = vld [vmem:[%s7101_s24 + $0x30] sm:$0xff] }
 0x48d   : > { %4412 = vmatprep.mubr.msk.f32.mxu0 %vm1750_vm2, %v2085_v7 }
 0x48e   : > { %v1989_v9 = vpop.f32.mrb[2].mxu0  ;;  %4413 = vmatmul.mubr.msk.f32.vlgmr.msra.gmra.mrb[4].mxu0 %vm1750_vm2, %v2086_v6  ;;  %v2540_v6 = vld [vmem:[%s7101_s24 + $0x38] sm:$0xff] }
 0x48f   : > { %v6463_v10 = vadd.f32 %v4171_v8, %v1989_v9  ;;  %v4392_v11 = vpop.f32.mrb[3].mxu0  ;;  %4671 = vmatpush3.bf16.msra.mxu0 %v4668_v62  ;;  %v6521_v62 = vpack.c.bf16 %v2536_v60, %v2535_v59  ;;  %v4695_v7 = vpack.c.bf16 %v2540_v6, %v2539_v5  ;;  %v2519_v8 = vlaneseq  ;;  %v2881_v59 = vld [vmem:[%s7107_s1 + $0x18] sm:$0xff] }
 0x490   : > { %4673 = vmatprep.subr.bf16.mxu0 %v4672_v15 }
 0x491   : > { %4423 = vmatprep.mubr.msk.f32.mxu1 %vm1750_vm2, %v6463_v10  ;;  %3507 = vst.msk [vmem:[%s6969_s2] sm:$0xff] %vm1750_vm2, %v6463_v10  ;;  %s7103_s2 = smov %s7102_s10  ;;  %v2520_v9 = vshrl.u32 %v2519_v8, 7 }
 0x492   : > { %4424 = vmatmul.mubr.msk.f32.vlgmr.msra.gmra.mrb[6].mxu1 %vm1750_vm2, %v1651_v12  ;;  %v2791_v20 = vld [vmem:[%s7103_s2 + $0x8] sm:$0xff]  ;;  %v2792_v24 = vld [vmem:[%s7103_s2 + $0x10] sm:$0xff]  ;;  %v2797_v35 = vld [vmem:[%s7103_s2 + $0x38] sm:$0xff] }
 0x493   : > { %4447 = vmatprep.mubr.msk.f32.mxu1 %vm5798_vm0, %v5799_v1  ;;  %4675 = vmatpush3.bf16.msra.mxu0 %v4672_v15  ;;  %v2521_v11 = vsub.s32 0, %v2520_v9  ;;  %v6540_v15 = vld [vmem:[#allocation22] ss:$0 sm:$0xff]  ;;  %v3339_v9 = vsel %vm1750_vm2, %v6463_v10, 0.0 }
 0x494   : > { %4682 = vmatprep.subr.bf16.mxu0 %v5797_v0  ;;  %4678 = vmatpush3.bf16.msra.mxu1 %v4677_v19  ;;  %v2790_v19 = vld [vmem:[%s7102_s10] sm:$0xff]  ;;  %s7105_s10 = sld [smem:[#allocation72_spill]] }
 0x495   : > { %4679 = vmatprep.subr.bf16.mxu1 %v5797_v0 }
 0x498   : > { %4681 = vmatpush3.bf16.msra.mxu1 %v4680_v21 }
 0x499   : > { %4445 = vmatprep.subr.mxu1 %v5799_v1 }
 0x49a   : > { %s7106_s3 = smov %s7105_s10 }
 0x49c   : > { %4446 = vmatpush3.msra.mxu1 %v2369_v22  ;;  %v6545_v22 = vpack.c.bf16 %v2791_v20, %v2790_v19 }
 0x49d   : > { %4697 = vmatprep.subr.bf16.mxu1 %v5797_v0 }
 0x561   : > { %v4414_v26 = vpop.f32.mrb[4].mxu0 }
 0x562   : > { %v2176_v28 = vadd.f32 %v4414_v26, %v4176_v25  ;;  %v2170_v29 = vpop.f32.mrb[5].mxu0 }
 0x563   : > { %v2171_v31 = vadd.f32 %v4176_v25, %v2170_v29  ;;  %v2793_v25 = vld [vmem:[%s7103_s2 + $0x18] sm:$0xff]  ;;  %v2794_v29 = vld [vmem:[%s7103_s2 + $0x20] sm:$0xff] }
 0x564   : > { %4448 = vmatmul.mubr.msk.f32.vlgmr.msra.gmra.mrb[8].mxu1 %vm1664_vm1, %v2176_v28 }
 0x565   : > { %v4425_v32 = vpop.f32.mrb[6].mxu1  ;;  %4699 = vmatpush3.bf16.msra.mxu1 %v4698_v27  ;;  %4484 = vmatprep.mubr.msk.f32.mxu1 %vm5798_vm0, %v5799_v1  ;;  %v6551_v27 = vpack.c.bf16 %v2793_v25, %v2792_v24 }
 0x566   : > { %v2268_v33 = vadd.f32 %v4425_v32, %v4179_v30  ;;  %v2262_v34 = vpop.f32.mrb[7].mxu1  ;;  %4482 = vmatprep.subr.mxu1 %v5799_v1 }
 0x567   : > { %v2263_v37 = vadd.f32 %v4179_v30, %v2262_v34  ;;  %v2795_v30 = vld [vmem:[%s7103_s2 + $0x28] sm:$0xff]  ;;  %v2796_v34 = vld [vmem:[%s7103_s2 + $0x30] sm:$0xff]  ;;  %s7108_s2 = sld [smem:[#allocation81_spill]] }
 0x568   : > { %v2272_v40 = vmax.f32 %v2268_v33, 0.0  ;;  %v6559_v33 = vpack.c.bf16 %v2795_v30, %v2794_v29 }
 0x569   : > { %v2271_v38 = vmax.f32 %v2263_v37, 0.0  ;;  %4483 = vmatpush3.msra.mxu1 %v2624_v41  ;;  %v6568_v37 = vpack.c.bf16 %v2797_v35, %v2796_v34  ;;  %v2883_v41 = vld [vmem:[%s7106_s3 + $0x8] sm:$0xff] }
 0x56a   : > { %4700 = vmatprep.subr.bf16.mxu1 %v5797_v0 }
 0x56b   : > { %4434 = vmatprep.mubr.msk.f32.mxu0 %vm1750_vm2, %v2271_v38 }
 0x56c   : > { %4435 = vmatmul.mubr.msk.f32.vlgmr.msra.gmra.mrb[6].mxu0 %vm1750_vm2, %v2272_v40  ;;  %v2882_v40 = vld [vmem:[%s7105_s10] sm:$0xff]  ;;  %s6975_s10 = scalar_lea.vmem [#allocation28], %s6353_s19 }
 0x56d   : > { %4684 = vmatpush3.bf16.msra.mxu0 %v4683_v39  ;;  %4456 = vmatprep.mubr.msk.f32.mxu0 %vm5798_vm0, %v5799_v1 }
 0x56e   : > { %4454 = vmatprep.subr.mxu0 %v5799_v1 }
 0x571   : > { %4455 = vmatpush3.msra.mxu0 %v2445_v42  ;;  %v2884_v42 = vld [vmem:[%s7106_s3 + $0x10] sm:$0xff] }
 0x572   : > { %4685 = vmatprep.subr.bf16.mxu0 %v5797_v0 }
 0x637   : > { %v2439_v44 = vpop.f32.mrb[8].mxu1 }
 0x638   : > { %v4449_v45 = vpop.f32.mrb[9].mxu1  ;;  %v2522_v12 = vrot.slane %v2439_v44, %v2521_v11  ;;  %v4719_v44 = vpack.c.bf16 %v2883_v41, %v2882_v40 }
 0x639   : > { %v2885_v45 = vld [vmem:[%s7106_s3 + $0x18] sm:$0xff]  ;;  %s7109_s3 = sld [smem:[#allocation78_spill]] }
 0x63a   : > { %v4722_v46 = vpack.c.bf16 %v2885_v45, %v2884_v42 }
 0x63f   : > { %v4436_v51 = vpop.f32.mrb[6].mxu0  ;;  %v3114_v5 = vld [vmem:[%s7109_s3 + $0x18] sm:$0xff] }
 0x640   : > { %v2362_v53 = vadd.f32 %v4436_v51, %v4182_v48  ;;  %v2356_v54 = vpop.f32.mrb[7].mxu0  ;;  %v2878_v51 = vld [vmem:[%s7107_s1] sm:$0xff] }
 0x641   : > { %v2357_v57 = vadd.f32 %v4182_v48, %v2356_v54 }
 0x642   : > { %4485 = vmatmul.mubr.msk.f32.vlgmr.msra.gmra.mrb[10].mxu1 %vm1834_vm3, %v2362_v53  ;;  %v6599_v53 = vld [vmem:[%s7108_s2] ss:$0 sm:$0xff]  ;;  %s7110_s2 = sld [smem:[#allocation77_spill]] }
 0x643   : > { %4702 = vmatpush3.bf16.msra.mxu1 %v4701_v52  ;;  %4457 = vmatmul.mubr.msk.f32.vlgmr.msra.gmra.mrb[8].mxu0 %vm1834_vm3, %v2357_v57  ;;  %v2879_v52 = vld [vmem:[%s7107_s1 + $0x8] sm:$0xff] }
 0x644   : > { %4703 = vmatprep.subr.bf16.mxu1 %v5797_v0  ;;  %4497 = vmatprep.mubr.msk.f32.mxu1 %vm5798_vm0, %v5799_v1  ;;  %v4725_v55 = vpack.c.bf16 %v2879_v52, %v2878_v51 }
 0x645   : > { %4687 = vmatpush3.bf16.msra.mxu0 %v6511_v58  ;;  %4475 = vmatprep.mubr.msk.f32.mxu0 %vm5798_vm0, %v5799_v1 }
 0x646   : > { %4688 = vmatprep.subr.bf16.mxu0 %v5797_v0 }
 0x647   : > { %4705 = vmatpush3.bf16.msra.mxu1 %v4704_v61  ;;  %v3111_v61 = vld [vmem:[%s7109_s3] sm:$0xff] }
 0x648   : > { %4495 = vmatprep.subr.mxu1 %v5799_v1  ;;  %v3107_v43 = vld [vmem:[%s7110_s2] sm:$0xff]  ;;  %v3108_v8 = vld [vmem:[%s7110_s2 + $0x8] sm:$0xff] }
 0x649   : > { %4690 = vmatpush3.bf16.msra.mxu0 %v6521_v62 }
 0x64a   : > { %4691 = vmatprep.subr.bf16.mxu0 %v5797_v0 }
 0x64b   : > { %4496 = vmatpush3.msra.mxu1 %v2702_v3  ;;  %v3331_v3 = vrot.slane %v3330_v63, 4 }
 0x64c   : > { %4498 = vmatmul.mubr.msk.f32.vlgmr.msra.gmra.mrb[12].mxu1 %vm1664_vm1, %v2171_v31  ;;  %4718 = vmatprep.subr.bf16.mxu1 %v5797_v0 }
 0x64d   : > { %4693 = vmatpush3.bf16.msra.mxu0 %v4692_v4  ;;  %4527 = vmatprep.mubr.msk.f32.mxu1 %vm5798_vm0, %v5799_v1 }
 0x64e   : > { %4694 = vmatprep.subr.bf16.mxu0 %v5797_v0  ;;  %4720 = vmatpush3.bf16.msra.mxu1 %v4719_v44 }
 0x64f   : > { %4721 = vmatprep.subr.bf16.mxu1 %v5797_v0 }
 0x651   : > { %4696 = vmatpush3.bf16.msra.mxu0 %v4695_v7 }
 0x652   : > { %4706 = vmatprep.subr.bf16.mxu0 %v5797_v0  ;;  %4723 = vmatpush3.bf16.msra.mxu1 %v4722_v46 }
 0x653   : > { %4724 = vmatprep.subr.bf16.mxu1 %v5797_v0 }
 0x715   : > { %v2694_v13 = vpop.f32.mrb[10].mxu1 }
 0x716   : > { %v2515_v14 = vpop.f32.mrb[8].mxu0  ;;  %v4486_v16 = vpop.f32.mrb[11].mxu1  ;;  %v2779_v26 = vrot.slane %v2694_v13, %v2521_v11  ;;  %v4749_v11 = vpack.c.bf16 %v3108_v8, %v3107_v43  ;;  %v3340_v13 = vrot.slane %v3339_v9, 4 }
 0x717   : > { %v2523_v17 = vadd.f32 %v2522_v12, %v2515_v14  ;;  %v4458_v18 = vpop.f32.mrb[9].mxu0  ;;  %v3109_v14 = vld [vmem:[%s7110_s2 + $0x10] sm:$0xff]  ;;  %v3110_v16 = vld [vmem:[%s7110_s2 + $0x18] sm:$0xff]  ;;  %s7116_s2 = sld [smem:[#allocation87_spill]] }
 0x718   : > { %v3341_v10 = vadd.f32 %v3340_v13, %v3339_v9 }
 0x719   : > { %v2531_v21 = vadd.f32 %v6540_v15, %v2523_v17  ;;  %v4752_v17 = vpack.c.bf16 %v3110_v16, %v3109_v14 }
 0x71a   : > { %v3342_v24 = vrot.slane %v3341_v10, 2 }
 0x71b   : > { %v2532_v23 = vmax.f32 %v2531_v21, 0.0 }
 0x71c   : > { %v3343_v30 = vadd.f32 %v3342_v24, %v3341_v10 }
 0x71d   : > { %4476 = vmatmul.mubr.msk.f32.vlgmr.msra.gmra.mrb[10].mxu0 %vm2548_vm4, %v2532_v23 }
 0x71e   : > { %4708 = vmatpush3.bf16.msra.mxu0 %v6545_v22  ;;  %4516 = vmatprep.mubr.msk.f32.mxu0 %vm5798_vm0, %v5799_v1 }
 0x71f   : > { %v2772_v28 = vpop.f32.mrb[12].mxu1  ;;  %4709 = vmatprep.subr.bf16.mxu0 %v5797_v0 }
 0x720   : > { %v2780_v31 = vadd.f32 %v2779_v26, %v2772_v28  ;;  %v4499_v32 = vpop.f32.mrb[13].mxu1 }
 0x722   : > { %4711 = vmatpush3.bf16.msra.mxu0 %v6551_v27  ;;  %v2788_v38 = vadd.f32 %v6565_v36, %v2780_v31 }
 0x723   : > { %4712 = vmatprep.subr.bf16.mxu0 %v5797_v0 }
 0x724   : > { %v2789_v39 = vmax.f32 %v2788_v38, 0.0  ;;  %v3344_v38 = vrot.slane %v3343_v30, 1 }
 0x726   : > { %4714 = vmatpush3.bf16.msra.mxu0 %v6559_v33  ;;  %v3345_v42 = vadd.f32 %v3344_v38, %v3343_v30 }
 0x727   : > { %4715 = vmatprep.subr.bf16.mxu0 %v5797_v0 }
 0x728   : > { %v3346_v44 = vmul.f32 0.125, %v3345_v42 }
 0x72a   : > { %4717 = vmatpush3.bf16.msra.mxu0 %v6568_v37 }
 0x72b   : > { %4730 = vmatprep.subr.bf16.mxu0 %v5797_v0 }
 0x72d   : > { %4517 = vmatmul.mubr.msk.f32.vlgmr.msra.gmra.mrb[12].mxu0 %vm2548_vm4, %v2789_v39 }
 0x72e   : > { %4732 = vmatpush3.bf16.msra.mxu0 %v6511_v58  ;;  %4557 = vmatprep.mubr.msk.f32.mxu0 %vm5798_vm0, %v5799_v1  ;;  %v2880_v58 = vld [vmem:[%s7107_s1 + $0x10] sm:$0xff]  ;;  %s7113_s1 = sld [smem:[#allocation84_spill]] }
 0x72f   : > { %4733 = vmatprep.subr.bf16.mxu0 %v5797_v0  ;;  %v4728_v60 = vpack.c.bf16 %v2881_v59, %v2880_v58 }
 0x732   : > { %4735 = vmatpush3.bf16.msra.mxu0 %v6521_v62  ;;  %v3112_v62 = vld [vmem:[%s7109_s3 + $0x8] sm:$0xff] }
 0x733   : > { %4736 = vmatprep.subr.bf16.mxu0 %v5797_v0  ;;  %v4743_v2 = vpack.c.bf16 %v3112_v62, %v3111_v61 }
 0x734   : > { %v3427_v31 = vld [vmem:[%s7113_s1] sm:$0xff]  ;;  %v3428_v32 = vld [vmem:[%s7113_s1 + $0x8] sm:$0xff]  ;;  %v3429_v39 = vld [vmem:[%s7113_s1 + $0x10] sm:$0xff] }
 0x735   : > { %v4773_v34 = vpack.c.bf16 %v3428_v32, %v3427_v31  ;;  %v3430_v40 = vld [vmem:[%s7113_s1 + $0x18] sm:$0xff]  ;;  %s7115_s1 = sld [smem:[#allocation85_spill]] }
 0x736   : > { %4738 = vmatpush3.bf16.msra.mxu0 %v4692_v4  ;;  %v3113_v4 = vld [vmem:[%s7109_s3 + $0x10] sm:$0xff]  ;;  %v4776_v41 = vpack.c.bf16 %v3430_v40, %v3429_v39  ;;  %s6987_s3 = scalar_lea.vmem [#allocation34], %s6350_s0 }
 0x737   : > { %4739 = vmatprep.subr.bf16.mxu0 %v5797_v0  ;;  %v4746_v6 = vpack.c.bf16 %v3114_v5, %v3113_v4 }
 0x73a   : > { %4741 = vmatpush3.bf16.msra.mxu0 %v4695_v7  ;;  %v3332_v7 = vadd.f32 %v3331_v3, %v3330_v63 }
 0x73b   : > { %4754 = vmatprep.subr.bf16.mxu0 %v5797_v0 }
 0x73c   : > { %v3333_v12 = vrot.slane %v3332_v7, 2 }
 0x73e   : > { %v3334_v18 = vadd.f32 %v3333_v12, %v3332_v7 }
 0x740   : > { %v3335_v23 = vrot.slane %v3334_v18, 1 }
 0x742   : > { %v3336_v29 = vadd.f32 %v3335_v23, %v3334_v18 }
 0x744   : > { %v3338_v35 = vmul.f32 0.125, %v3336_v29 }
 0x7f0   : > { %v2618_v48 = vpop.f32.mrb[10].mxu0 }
 0x7f1   : > { %v2619_v49 = vadd.f32 %v6589_v47, %v2618_v48  ;;  %v4477_v50 = vpop.f32.mrb[11].mxu0 }
 0x7f3   : > { %3508 = vst.msk [vmem:[%s6975_s10] sm:$0xff] %vm1750_vm2, %v2619_v49  ;;  %s7111_s10 = sld [smem:[#allocation82_spill]] }
 0x7f9   : > { %v3347_v19 = vld [vmem:[%s7111_s10] sm:$0xff] }
 0x800   : > { %v2874_v54 = vpop.f32.mrb[12].mxu0 }
 0x801   : > { %v2875_v56 = vadd.f32 %v6599_v53, %v2874_v54  ;;  %v4518_v57 = vpop.f32.mrb[13].mxu0 }
 0x803   : > { %4528 = vmatmul.mubr.msk.f32.vlgmr.msra.gmra.mrb[14].mxu1 %vm1750_vm2, %v2875_v56  ;;  %3509 = vst.msk [vmem:[%s6976_s4] sm:$0xff] %vm1750_vm2, %v2875_v56  ;;  %s7112_s4 = smov %s7111_s10  ;;  %s7114_s10 = sld [smem:[#allocation83_spill]] }
 0x804   : > { %4726 = vmatpush3.bf16.msra.mxu1 %v4725_v55  ;;  %4538 = vmatprep.mubr.msk.f32.mxu1 %vm5798_vm0, %v5799_v1  ;;  %v3348_v20 = vld [vmem:[%s7112_s4 + $0x8] sm:$0xff]  ;;  %v3349_v25 = vld [vmem:[%s7112_s4 + $0x10] sm:$0xff]  ;;  %v3350_v26 = vld [vmem:[%s7112_s4 + $0x18] sm:$0xff]  ;;  %s6989_s4 = scalar_lea.vmem [#allocation35], %s6350_s0 }
 0x805   : > { %4727 = vmatprep.subr.bf16.mxu1 %v5797_v0  ;;  %v4767_v21 = vpack.c.bf16 %v3348_v20, %v3347_v19  ;;  %v4770_v28 = vpack.c.bf16 %v3350_v26, %v3349_v25 }
 0x808   : > { %4729 = vmatpush3.bf16.msra.mxu1 %v4728_v60 }
 0x809   : > { %4742 = vmatprep.subr.bf16.mxu1 %v5797_v0 }
 0x80b   : > { %4539 = vmatmul.mubr.msk.f32.vlgmr.msra.gmra.mrb[16].mxu1 %vm1750_vm2, %v2619_v49 }
 0x80c   : > { %4744 = vmatpush3.bf16.msra.mxu1 %v4743_v2  ;;  %4568 = vmatprep.mubr.msk.f32.mxu1 %vm5798_vm0, %v5799_v1 }
 0x80d   : > { %4745 = vmatprep.subr.bf16.mxu1 %v5797_v0 }
 0x810   : > { %4747 = vmatpush3.bf16.msra.mxu1 %v4746_v6 }
 0x811   : > { %4748 = vmatprep.subr.bf16.mxu1 %v5797_v0 }
 0x813   : > { %4569 = vmatmul.mubr.msk.f32.vlgmr.msra.gmra.mrb[18].mxu1 %vm1750_vm2, %v2619_v49 }
 0x814   : > { %4750 = vmatpush3.bf16.msra.mxu1 %v4749_v11  ;;  %4579 = vmatprep.mubr.msk.f32.mxu1 %vm5798_vm0, %v5799_v1 }
 0x815   : > { %4751 = vmatprep.subr.bf16.mxu1 %v5797_v0 }
 0x818   : > { %4753 = vmatpush3.bf16.msra.mxu1 %v4752_v17 }
 0x819   : > { %4766 = vmatprep.subr.bf16.mxu1 %v5797_v0 }
 0x81b   : > { %4580 = vmatmul.mubr.msk.f32.vlgmr.msra.gmra.mrb[20].mxu1 %vm1750_vm2, %v2875_v56 }
 0x81c   : > { %4768 = vmatpush3.bf16.msra.mxu1 %v4767_v21  ;;  %4609 = vmatprep.mubr.msk.f32.mxu1 %vm5798_vm0, %v5799_v1 }
 0x81d   : > { %4769 = vmatprep.subr.bf16.mxu1 %v5797_v0 }
 0x820   : > { %4771 = vmatpush3.bf16.msra.mxu1 %v4770_v28 }
 0x821   : > { %4772 = vmatprep.subr.bf16.mxu1 %v5797_v0 }
 0x823   : > { %4610 = vmatmul.mubr.msk.f32.vlgmr.msra.gmra.mrb[22].mxu1 %vm1750_vm2, %v3338_v35 }
 0x824   : > { %4774 = vmatpush3.bf16.msra.mxu1 %v4773_v34  ;;  %4620 = vmatprep.mubr.msk.f32.mxu1 %vm5798_vm0, %v5799_v1 }
 0x825   : > { %4775 = vmatprep.subr.bf16.mxu1 %v5797_v0 }
 0x828   : > { %4777 = vmatpush3.bf16.msra.mxu1 %v4776_v41 }
 0x82b   : > { %4621 = vmatmul.mubr.msk.f32.vlgmr.msra.gmra.mrb[24].mxu1 %vm1750_vm2, %v3346_v44 }
 0x8d6   : > { %v2955_v45 = vpop.f32.mrb[14].mxu1 }
 0x8d7   : > { %v4529_v46 = vpop.f32.mrb[15].mxu1 }
 0x8de   : > { %v3028_v48 = vpop.f32.mrb[16].mxu1 }
 0x8df   : > { %v3029_v49 = vadd.f32 %v3028_v48, %v2955_v45  ;;  %v4540_v50 = vpop.f32.mrb[17].mxu1 }
 0x8e1   : > { %v3032_v51 = vadd.f32 %v6540_v15, %v3029_v49 }
 0x8e3   : > { %v3033_v52 = vmax.f32 %v3032_v51, 0.0 }
 0x8e5   : > { %4558 = vmatmul.mubr.msk.f32.vlgmr.msra.gmra.mrb[14].mxu0 %vm2548_vm4, %v3033_v52 }
 0x8e6   : > { %v3181_v54 = vpop.f32.mrb[18].mxu1  ;;  %4756 = vmatpush3.bf16.msra.mxu0 %v6545_v22  ;;  %4598 = vmatprep.mubr.msk.f32.mxu0 %vm5798_vm0, %v5799_v1 }
 0x8e7   : > { %v4570_v55 = vpop.f32.mrb[19].mxu1  ;;  %4757 = vmatprep.subr.bf16.mxu0 %v5797_v0 }
 0x8ea   : > { %4759 = vmatpush3.bf16.msra.mxu0 %v6551_v27  ;;  %v3351_v27 = vld [vmem:[%s7114_s10] sm:$0x1]  ;;  %s6675_s10 = sshll.u32 %s6064_s18, 7 }
 0x8eb   : > { %4760 = vmatprep.subr.bf16.mxu0 %v5797_v0  ;;  %s6679_s5 = scalar_lea.hbm %s7116_s2, %s6675_s10 }
 0x8ee   : > { %v3251_v15 = vpop.f32.mrb[20].mxu1  ;;  %4762 = vmatpush3.bf16.msra.mxu0 %v6559_v33 }
 0x8ef   : > { %v3252_v56 = vadd.f32 %v3251_v15, %v3181_v54  ;;  %v4581_v57 = vpop.f32.mrb[21].mxu1  ;;  %4763 = vmatprep.subr.bf16.mxu0 %v5797_v0  ;;  %v3431_v0 = vld [vmem:[%s7115_s1] sm:$0x1]  ;;  %s5800_s1 = smov [#allocation26]  }
 0x8f1   : > { %v3255_v1 = vadd.f32 %v6565_v36, %v3252_v56 }
 0x8f2   : > { %4765 = vmatpush3.bf16.msra.mxu0 %v6568_v37 }
 0x8f3   : > { %v3256_v22 = vmax.f32 %v3255_v1, 0.0 }
 0x8f5   : > { %4599 = vmatmul.mubr.msk.f32.vlgmr.msra.gmra.mrb[16].mxu0 %vm2548_vm4, %v3256_v22 }
 0x8f6   : > { %v3421_v58 = vpop.f32.mrb[22].mxu1 }
 0x8f7   : > { %v3422_v33 = vadd.f32 %v3421_v58, %v3351_v27  ;;  %v4611_v59 = vpop.f32.mrb[23].mxu1 }
 0x8f9   : > { %3426 = vst.msk [vmem:[%s6987_s3] sm:$0x1] %vm3425_vm5, %v3422_v33  ;;  %s5432_s3 = sshll.u32 %s5800_s1, 4  ;;  %s5433_s3 = int_to_ptr.vmem [resolvable:$false] %s5432_s3 }
 0x8fa   : > { %s5434_s13 = scalar_lea.vmem %s5433_s3, 256  ;;  %p5435_p3 = scmp.lt.s32.totalorder %s3573_s8, %s5433_s3 }
 0x8fb   : > { %p5436_p1 = scmp.lt.s32.totalorder %s5434_s13, %s5428_s12 }
 0x8fd   : > { %p5437_p4 = por %p5436_p1, %p5435_p3 }
 0x8fe   : > { %v3501_v36 = vpop.f32.mrb[24].mxu1 }
 0x8ff   : > { %v3502_v60 = vadd.f32 %v3501_v36, %v3431_v0  ;;  %v4622_v37 = vpop.f32.mrb[25].mxu1  ;;  %p5438_p8 = pnand %p5437_p4, %p5431_p12 }
 0x901   : > { %3505 = vst.msk [vmem:[%s6989_s4] sm:$0x1] %vm3425_vm5, %v3502_v60 }
 0x902   : > { %5441 = shalt.err (!%p5438_p8)
}
 0x903   : > { %s5442_s6 = scalar_lea.hbm %s6679_s5, 128  ;;  %s5446_s1 = scalar_lea.hbm %s7116_s2, 256 }
 0x904   : > { %p5443_p11 = scmp.ne.s32.totalorder %s6679_s5, %s5442_s6  ;;  %p5447_p2 = scmp.lt.u32.totalorder %s6679_s5, %s7116_s2 }
 0x905   : > { %p5448_p5 = scmp.lt.u32.totalorder %s5446_s1, %s5442_s6  ;;  %p5450_p6 = scmp.lt.u32.totalorder %s5442_s6, %s6679_s5 }
 0x906   : > { %p5444_p7 = pnand %p5443_p11, %p7118_p0 }
 0x907   : > { %p5449_p10 = por %p5448_p5, %p5447_p2 }
 0x908   : > { %p5445_p13 = pneg %p5444_p7 }
 0x909   : > { %p5451_p9 = por %p5450_p6, %p5449_p10 }
 0x90b   : > { %p5452_p12 = pnand %p5451_p9, %p5445_p13 }
 0x90d   : > { %5455 = shalt.err (!%p5452_p12)
}
 0x90e   : > { %s7119_s3 = sld [smem:[#allocation89_spill]]  ;;  %s7120_s13 = scalar_lea.vmem [#allocation29], %s6353_s19 }
 0x90f   : > { %4829 = dma.vmem_to_hbm [thread:$0]  (%p7118_p0), %s3573_s8, 128, %s6679_s5, %s6993_s9  }
 0x910   : > { %s3598_s1 = sshll.u32 %s7120_s13, 4  ;;  %s6996_s6 = scalar_lea.sflag [#allocation30], %s6362_s20  ;;  %s3599_s1 = int_to_ptr.vmem [resolvable:$true] %s3598_s1 }
 0x911   : > { %s5456_s4 = scalar_lea.vmem %s3599_s1, 128  ;;  %s5801_s2 = smov [#allocation29]  }
 0x912   : > { %p5457_p3 = scmp.ne.s32.totalorder %s3599_s1, %s5456_s4  ;;  %s5460_s14 = sshll.u32 %s5801_s2, 4  ;;  %s5461_s14 = int_to_ptr.vmem [resolvable:$false] %s5460_s14 }
 0x913   : > { %s5462_s15 = scalar_lea.vmem %s5461_s14, 256  ;;  %p5463_p8 = scmp.lt.s32.totalorder %s3599_s1, %s5461_s14 }
 0x914   : > { %s6701_s12 = scalar_lea.hbm %s7119_s3, %s6675_s10  ;;  %p5458_p1 = pnand %p5457_p3, %p7118_p0 }
 0x915   : > { %p5464_p11 = scmp.lt.s32.totalorder %s5462_s15, %s5456_s4 }
 0x916   : > { %p5459_p4 = pneg %p5458_p1 }
 0x917   : > { %p5465_p7 = por %p5464_p11, %p5463_p8 }
 0x919   : > { %p5466_p13 = pnand %p5465_p7, %p5459_p4 }
 0x91b   : > { %5469 = shalt.err (!%p5466_p13)
}
 0x91c   : > { %s5470_s5 = scalar_lea.hbm %s6701_s12, 128  ;;  %s5474_s8 = scalar_lea.hbm %s7119_s3, 256 }
 0x91d   : > { %p5471_p2 = scmp.ne.s32.totalorder %s6701_s12, %s5470_s5  ;;  %p5475_p6 = scmp.lt.u32.totalorder %s6701_s12, %s7119_s3 }
 0x91e   : > { %p5476_p9 = scmp.lt.u32.totalorder %s5474_s8, %s5470_s5  ;;  %p5478_p3 = scmp.lt.u32.totalorder %s5470_s5, %s6701_s12 }
 0x91f   : > { %p5472_p5 = pnand %p5471_p2, %p7118_p0 }
 0x920   : > { %p5477_p12 = por %p5476_p9, %p5475_p6 }
 0x921   : > { %p5473_p10 = pneg %p5472_p5 }
 0x922   : > { %p5479_p1 = por %p5478_p3, %p5477_p12 }
 0x924   : > { %p5480_p4 = pnand %p5479_p1, %p5473_p10 }
 0x926   : > { %5483 = shalt.err (!%p5480_p4)
}
 0x927   : > { %s7121_s14 = sld [smem:[#allocation86_spill]]  ;;  %s7122_s4 = sld [smem:[#allocation88_spill]] }
 0x928   : > { %4831 = dma.vmem_to_hbm [thread:$0]  (%p7118_p0), %s3599_s1, 128, %s6701_s12, %s6996_s6  }
 0x929   : > { %s7123_s2 = scalar_lea.vmem [#allocation25], %s6353_s19  ;;  %s7124_s8 = scalar_lea.vmem [#allocation28], %s6353_s19 }
 0x92a   : > { %s3559_s13 = sshll.u32 %s7123_s2, 4  ;;  %s6735_s9 = sshll.u32 %s7124_s8, 4  ;;  %s6731_s13 = int_to_ptr.vmem [resolvable:$true] %s3559_s13  ;;  %s3586_s9 = int_to_ptr.vmem [resolvable:$true] %s6735_s9 }
 0x92b   : > { %s3513_s3 = scalar_lea.sflag [#allocation4], %s6350_s0  ;;  %s5484_s16 = scalar_lea.vmem %s6731_s13, 128 }
 0x92c   : > { %p5485_p8 = scmp.ne.s32.totalorder %s6731_s13, %s5484_s16  ;;  %s5802_s12 = smov [#allocation25]  }
 0x92d   : > { %s6723_s15 = scalar_lea.hbm %s7121_s14, %s6675_s10  ;;  %s6729_s5 = scalar_lea.hbm %s7122_s4, %s6675_s10 }
 0x92e   : > { %p5486_p11 = pnand %p5485_p8, %p7118_p0  ;;  %s5488_s1 = sshll.u32 %s5802_s12, 4  ;;  %s5489_s1 = int_to_ptr.vmem [resolvable:$false] %s5488_s1 }
 0x92f   : > { %s5490_s2 = scalar_lea.vmem %s5489_s1, 256  ;;  %p5491_p13 = scmp.lt.s32.totalorder %s6731_s13, %s5489_s1 }
 0x930   : > { %p5487_p7 = pneg %p5486_p11  ;;  %p5492_p2 = scmp.lt.s32.totalorder %s5490_s2, %s5484_s16 }
 0x932   : > { %p5493_p5 = por %p5492_p2, %p5491_p13 }
 0x934   : > { %p5494_p10 = pnand %p5493_p5, %p5487_p7 }
 0x936   : > { %5497 = shalt.err (!%p5494_p10)
}
 0x937   : > { %s5498_s8 = scalar_lea.hbm %s6723_s15, 128  ;;  %s5502_s12 = scalar_lea.hbm %s7121_s14, 256 }
 0x938   : > { %p5499_p6 = scmp.ne.s32.totalorder %s6723_s15, %s5498_s8  ;;  %p5503_p3 = scmp.lt.u32.totalorder %s6723_s15, %s7121_s14 }
 0x939   : > { %p5504_p1 = scmp.lt.u32.totalorder %s5502_s12, %s5498_s8  ;;  %p5506_p8 = scmp.lt.u32.totalorder %s5498_s8, %s6723_s15 }
 0x93a   : > { %p5500_p9 = pnand %p5499_p6, %p7118_p0 }
 0x93b   : > { %p5505_p4 = por %p5504_p1, %p5503_p3 }
 0x93c   : > { %p5501_p12 = pneg %p5500_p9 }
 0x93d   : > { %p5507_p11 = por %p5506_p8, %p5505_p4 }
 0x93f   : > { %p5508_p7 = pnand %p5507_p11, %p5501_p12 }
 0x941   : > { %5511 = shalt.err (!%p5508_p7)
}
 0x942   : > { %4828 = dma.vmem_to_hbm [thread:$0]  (%p7118_p0), %s6731_s13, 128, %s6723_s15, %s3513_s3  }
 0x943   : > { %s5512_s16 = scalar_lea.vmem %s3586_s9, 128  ;;  %s5803_s1 = smov [#allocation28]  }
 0x944   : > { %p5513_p13 = scmp.ne.s32.totalorder %s3586_s9, %s5512_s16  ;;  %s5516_s2 = sshll.u32 %s5803_s1, 4  ;;  %s5517_s2 = int_to_ptr.vmem [resolvable:$false] %s5516_s2 }
 0x945   : > { %s5518_s8 = scalar_lea.vmem %s5517_s2, 256  ;;  %p5519_p10 = scmp.lt.s32.totalorder %s3586_s9, %s5517_s2 }
 0x946   : > { %p5514_p2 = pnand %p5513_p13, %p7118_p0  ;;  %p5520_p6 = scmp.lt.s32.totalorder %s5518_s8, %s5512_s16 }
 0x948   : > { %p5515_p5 = pneg %p5514_p2  ;;  %p5521_p9 = por %p5520_p6, %p5519_p10 }
 0x94a   : > { %p5522_p12 = pnand %p5521_p9, %p5515_p5 }
 0x94c   : > { %5525 = shalt.err (!%p5522_p12)
}
 0x94d   : > { %s5526_s3 = scalar_lea.hbm %s6729_s5, 128  ;;  %s5530_s15 = scalar_lea.hbm %s7122_s4, 256 }
 0x94e   : > { %p5527_p3 = scmp.ne.s32.totalorder %s6729_s5, %s5526_s3  ;;  %p5531_p8 = scmp.lt.u32.totalorder %s6729_s5, %s7122_s4 }
 0x94f   : > { %p5532_p11 = scmp.lt.u32.totalorder %s5530_s15, %s5526_s3  ;;  %p5534_p13 = scmp.lt.u32.totalorder %s5526_s3, %s6729_s5 }
 0x950   : > { %p5528_p1 = pnand %p5527_p3, %p7118_p0 }
 0x951   : > { %p5533_p7 = por %p5532_p11, %p5531_p8 }
 0x952   : > { %p5529_p4 = pneg %p5528_p1 }
 0x953   : > { %p5535_p2 = por %p5534_p13, %p5533_p7 }
 0x955   : > { %p5536_p5 = pnand %p5535_p2, %p5529_p4 }
 0x957   : > { %5539 = shalt.err (!%p5536_p5)
}
 0x958   : > { %s7125_s13 = scalar_lea.sflag [#allocation27], %s6362_s20  ;;  %s4215_s12 = sshll.u32 %s6064_s18, 4 }
 0x959   : > { %4830 = dma.vmem_to_hbm [thread:$0]  (%p7118_p0), %s3586_s9, 128, %s6729_s5, %s7125_s13  }
 0x95a   : > { %s6775_s16 = scalar_lea.hbm %s6041_s30, %s4215_s12  ;;  %s7126_s1 = scalar_lea.vmem [#allocation35], %s6350_s0 }
 0x95b   : > { %s3650_s2 = sshll.u32 %s7126_s1, 4  ;;  %s3547_s8 = scalar_lea.sflag [#allocation36], %s6350_s0  ;;  %s3651_s2 = int_to_ptr.vmem [resolvable:$true] %s3650_s2 }
 0x95c   : > { %s5540_s3 = scalar_lea.vmem %s3651_s2, 16  ;;  %s5804_s15 = smov [#allocation35]  }
 0x95d   : > { %p5541_p10 = scmp.ne.s32.totalorder %s3651_s2, %s5540_s3  ;;  %s5544_s6 = sshll.u32 %s5804_s15, 4  ;;  %s5545_s6 = int_to_ptr.vmem [resolvable:$false] %s5544_s6 }
 0x95e   : > { %s5546_s4 = scalar_lea.vmem %s5545_s6, 32  ;;  %p5547_p12 = scmp.lt.s32.totalorder %s3651_s2, %s5545_s6 }
 0x95f   : > { %p5542_p6 = pnand %p5541_p10, %p7118_p0  ;;  %p5548_p3 = scmp.lt.s32.totalorder %s5546_s4, %s5540_s3 }
 0x961   : > { %p5543_p9 = pneg %p5542_p6  ;;  %p5549_p1 = por %p5548_p3, %p5547_p12 }
 0x963   : > { %p5550_p4 = pnand %p5549_p1, %p5543_p9 }
 0x965   : > { %5553 = shalt.err (!%p5550_p4)
}
 0x966   : > { %s5554_s9 = scalar_lea.hbm %s6775_s16, 16  ;;  %s5558_s5 = scalar_lea.hbm %s6041_s30, 32 }
 0x967   : > { %p5555_p8 = scmp.ne.s32.totalorder %s6775_s16, %s5554_s9  ;;  %p5559_p13 = scmp.lt.u32.totalorder %s6775_s16, %s6041_s30 }
 0x968   : > { %p5560_p2 = scmp.lt.u32.totalorder %s5558_s5, %s5554_s9  ;;  %p5562_p10 = scmp.lt.u32.totalorder %s5554_s9, %s6775_s16 }
 0x969   : > { %p5556_p11 = pnand %p5555_p8, %p7118_p0 }
 0x96a   : > { %p5561_p5 = por %p5560_p2, %p5559_p13 }
 0x96b   : > { %p5557_p7 = pneg %p5556_p11 }
 0x96c   : > { %p5563_p6 = por %p5562_p10, %p5561_p5 }
 0x96e   : > { %p5564_p9 = pnand %p5563_p6, %p5557_p7 }
 0x970   : > { %5567 = shalt.err (!%p5564_p9)
}
 0x971   : > { %4835 = dma.vmem_to_hbm [thread:$0]  (%p7118_p0), %s3651_s2, 16, %s6775_s16, %s3547_s8  }
 0x972   : > { %s1625_s6 = scalar_lea.vmem [#allocation31], %s6353_s19  ;;  %s6797_s13 = scalar_lea.hbm %s6026_s21, %s6675_s10 }
 0x973   : > { %s3611_s4 = sshll.u32 %s1625_s6, 4  ;;  %s5805_s3 = smov [#allocation31]   ;;  %s3612_s4 = int_to_ptr.vmem [resolvable:$true] %s3611_s4 }
 0x974   : > { %s5568_s1 = scalar_lea.vmem %s3612_s4, 128  ;;  %s5572_s15 = sshll.u32 %s5805_s3, 4  ;;  %s5573_s15 = int_to_ptr.vmem [resolvable:$false] %s5572_s15 }
 0x975   : > { %p5569_p12 = scmp.ne.s32.totalorder %s3612_s4, %s5568_s1  ;;  %s5574_s16 = scalar_lea.vmem %s5573_s15, 256 }
 0x976   : > { %p5575_p4 = scmp.lt.s32.totalorder %s3612_s4, %s5573_s15  ;;  %p5576_p8 = scmp.lt.s32.totalorder %s5574_s16, %s5568_s1 }
 0x977   : > { %p5570_p3 = pnand %p5569_p12, %p7118_p0 }
 0x978   : > { %p5577_p11 = por %p5576_p8, %p5575_p4 }
 0x979   : > { %p5571_p1 = pneg %p5570_p3 }
 0x97b   : > { %p5578_p7 = pnand %p5577_p11, %p5571_p1 }
 0x9b8   : > { %v3103_v61 = vpop.f32.mrb[14].mxu0 }
 0x9b9   : > { %v3104_v62 = vadd.f32 %v6589_v47, %v3103_v61  ;;  %v4559_v63 = vpop.f32.mrb[15].mxu0 }
 0x9bb   : > { %3510 = vst.msk [vmem:[%s1625_s6] sm:$0xff] %vm1750_vm2, %v3104_v62 }
 0x9bc   : > { %5581 = shalt.err (!%p5578_p7)
}
 0x9bd   : > { %s5582_s2 = scalar_lea.hbm %s6797_s13, 128  ;;  %s5586_s8 = scalar_lea.hbm %s6026_s21, 256 }
 0x9be   : > { %p5583_p13 = scmp.ne.s32.totalorder %s6797_s13, %s5582_s2  ;;  %p5587_p10 = scmp.lt.u32.totalorder %s6797_s13, %s6026_s21 }
 0x9bf   : > { %p5588_p6 = scmp.lt.u32.totalorder %s5586_s8, %s5582_s2  ;;  %p5590_p12 = scmp.lt.u32.totalorder %s5582_s2, %s6797_s13 }
 0x9c0   : > { %p5584_p2 = pnand %p5583_p13, %p7118_p0 }
 0x9c1   : > { %p5589_p9 = por %p5588_p6, %p5587_p10 }
 0x9c2   : > { %p5585_p5 = pneg %p5584_p2 }
 0x9c3   : > { %p5591_p3 = por %p5590_p12, %p5589_p9 }
 0x9c5   : > { %p5592_p1 = pnand %p5591_p3, %p5585_p5 }
 0x9c7   : > { %5595 = shalt.err (!%p5592_p1)
}
 0x9c8   : > { %s7127_s9 = scalar_lea.sflag [#allocation30], %s6362_s20  ;;  %s7128_s5 = sld [smem:[#allocation90_spill]]  ;;  %v3326_v47 = vpop.f32.mrb[16].mxu0 }
 0x9c9   : > { %s7129_s6 = sld [smem:[#allocation91_spill]]  ;;  %s1632_s1 = scalar_lea.vmem [#allocation32], %s6353_s19  ;;  %v3327_v2 = vadd.f32 %v6599_v53, %v3326_v47  ;;  %v4600_v3 = vpop.f32.mrb[17].mxu0 }
 0x9ca   : > { %4832 = dma.vmem_to_hbm [thread:$0]  (%p7118_p0), %s3612_s4, 128, %s6797_s13, %s7127_s9  }
 0x9cb   : > { %s3624_s3 = sshll.u32 %s1632_s1, 4  ;;  %s7130_s15 = scalar_lea.vmem [#allocation34], %s6350_s0  ;;  %3511 = vst.msk [vmem:[%s1632_s1] sm:$0xff] %vm1750_vm2, %v3327_v2  ;;  %s6823_s3 = int_to_ptr.vmem [resolvable:$true] %s3624_s3 }
 0x9cc   : > { %s3637_s16 = sshll.u32 %s7130_s15, 4  ;;  %s3538_s0 = scalar_lea.sflag [#allocation33], %s6362_s20  ;;  %s6830_s16 = int_to_ptr.vmem [resolvable:$true] %s3637_s16 }
 0x9cd   : > { %s5596_s19 = scalar_lea.vmem %s6823_s3, 128 }
 0x9ce   : > { %s6821_s2 = scalar_lea.hbm %s7128_s5, %s6675_s10  ;;  %p5597_p4 = scmp.ne.s32.totalorder %s6823_s3, %s5596_s19 }
 0x9cf   : > { %s6828_s8 = scalar_lea.hbm %s7129_s6, %s4215_s12  ;;  %s5806_s10 = smov [#allocation32]  }
 0x9d0   : > { %p5598_p8 = pnand %p5597_p4, %p7118_p0  ;;  %s5600_s4 = sshll.u32 %s5806_s10, 4  ;;  %s5601_s4 = int_to_ptr.vmem [resolvable:$false] %s5600_s4 }
 0x9d1   : > { %s5602_s13 = scalar_lea.vmem %s5601_s4, 256  ;;  %p5603_p7 = scmp.lt.s32.totalorder %s6823_s3, %s5601_s4 }
 0x9d2   : > { %p5599_p11 = pneg %p5598_p8  ;;  %p5604_p13 = scmp.lt.s32.totalorder %s5602_s13, %s5596_s19 }
 0x9d4   : > { %p5605_p2 = por %p5604_p13, %p5603_p7 }
 0x9d6   : > { %p5606_p5 = pnand %p5605_p2, %p5599_p11 }
 0x9d8   : > { %5609 = shalt.err (!%p5606_p5)
}
 0x9d9   : > { %s5610_s18 = scalar_lea.hbm %s6821_s2, 128  ;;  %s5614_s12 = scalar_lea.hbm %s7128_s5, 256 }
 0x9da   : > { %p5611_p10 = scmp.ne.s32.totalorder %s6821_s2, %s5610_s18  ;;  %p5615_p12 = scmp.lt.u32.totalorder %s6821_s2, %s7128_s5 }
 0x9db   : > { %p5616_p3 = scmp.lt.u32.totalorder %s5614_s12, %s5610_s18  ;;  %p5618_p4 = scmp.lt.u32.totalorder %s5610_s18, %s6821_s2 }
 0x9dc   : > { %p5612_p6 = pnand %p5611_p10, %p7118_p0 }
 0x9dd   : > { %p5617_p1 = por %p5616_p3, %p5615_p12 }
 0x9de   : > { %p5613_p9 = pneg %p5612_p6 }
 0x9df   : > { %p5619_p8 = por %p5618_p4, %p5617_p1 }
 0x9e1   : > { %p5620_p11 = pnand %p5619_p8, %p5613_p9 }
 0x9e3   : > { %5623 = shalt.err (!%p5620_p11)
}
 0x9e4   : > { %4833 = dma.vmem_to_hbm [thread:$0]  (%p7118_p0), %s6823_s3, 128, %s6821_s2, %s3538_s0  }
 0x9e5   : > { %s5624_s9 = scalar_lea.vmem %s6830_s16, 16  ;;  %s5807_s1 = smov [#allocation34]  }
 0x9e6   : > { %p5625_p7 = scmp.ne.s32.totalorder %s6830_s16, %s5624_s9  ;;  %s5628_s15 = sshll.u32 %s5807_s1, 4  ;;  %s5629_s15 = int_to_ptr.vmem [resolvable:$false] %s5628_s15 }
 0x9e7   : > { %s5630_s19 = scalar_lea.vmem %s5629_s15, 32  ;;  %p5631_p5 = scmp.lt.s32.totalorder %s6830_s16, %s5629_s15 }
 0x9e8   : > { %p5626_p13 = pnand %p5625_p7, %p7118_p0  ;;  %p5632_p10 = scmp.lt.s32.totalorder %s5630_s19, %s5624_s9 }
 0x9ea   : > { %p5627_p2 = pneg %p5626_p13  ;;  %p5633_p6 = por %p5632_p10, %p5631_p5 }
 0x9ec   : > { %p5634_p9 = pnand %p5633_p6, %p5627_p2 }
 0x9ee   : > { %5637 = shalt.err (!%p5634_p9)
}
 0x9ef   : > { %s5638_s3 = scalar_lea.hbm %s6828_s8, 16  ;;  %s5642_s2 = scalar_lea.hbm %s7129_s6, 32 }
 0x9f0   : > { %p5639_p12 = scmp.ne.s32.totalorder %s6828_s8, %s5638_s3  ;;  %p5643_p4 = scmp.lt.u32.totalorder %s6828_s8, %s7129_s6 }
 0x9f1   : > { %p5644_p8 = scmp.lt.u32.totalorder %s5642_s2, %s5638_s3  ;;  %p5646_p7 = scmp.lt.u32.totalorder %s5638_s3, %s6828_s8 }
 0x9f2   : > { %p5640_p3 = pnand %p5639_p12, %p7118_p0 }
 0x9f3   : > { %p5645_p11 = por %p5644_p8, %p5643_p4 }
 0x9f4   : > { %p5641_p1 = pneg %p5640_p3 }
 0x9f5   : > { %p5647_p13 = por %p5646_p7, %p5645_p11 }
 0x9f7   : > { %p5648_p2 = pnand %p5647_p13, %p5641_p1 }
 0x9f9   : > { %5651 = shalt.err (!%p5648_p2)
}
 0x9fa   : > { %4834 = dma.vmem_to_hbm [thread:$0]  (%p7118_p0), %s6830_s16, 16, %s6828_s8, %s3538_s0  }
 0x9fb PF: > { %s7131_s10 = sld [smem:[#allocation92_spill]]  ;;  %s7132_s4 = sld [smem:[#allocation96_spill]] }
 0x9fc   : > { %p7134_p10 = scmp.ge.s32.totalorder %s5734_s11, 2 }
 0xa01   : > { %s3662_s13 = sand.u32 1, %s7131_s10   ;;  %p7133_p5 = scmp.ne.s32.totalorder %s7132_s4, 0 }
 0xa02   : > { %s3663_s12 = scalar_lea.sflag [#allocation4], %s3662_s13 }
 0xa03   : > { %p6877_p6 = pnand %p7134_p10, %p7133_p5 }
 0xa05   : > { %5701 = dma.done.wait (!%p6877_p6), %s3663_s12, 128  }
 0xa06   : > { %5703 = vsyncadd (!%p6877_p6), %s3663_s12, 4294967168  ;;  %s7136_s23 = sadd.s32 4294967294, %s5734_s11  }
 0xa07   : > { %s3671_s20 = sand.u32 1, %s7136_s23  }
 0xa08   : > { %s3672_s16 = scalar_lea.sflag [#allocation27], %s3671_s20 }
 0xa09   : > { %5705 = dma.done.wait (!%p6877_p6), %s3672_s16, 256  }
 0xa0a   : > { %5707 = vsyncadd (!%p6877_p6), %s3672_s16, 4294967040  ;;  %s3690_s8 = scalar_lea.sflag [#allocation30], %s3671_s20 }
 0xa0b   : > { %5709 = dma.done.wait (!%p6877_p6), %s3690_s8, 256  }
 0xa0c   : > { %5711 = vsyncadd (!%p6877_p6), %s3690_s8, 4294967040  ;;  %s3708_s0 = scalar_lea.sflag [#allocation33], %s3671_s20 }
 0xa0d   : > { %5713 = dma.done.wait (!%p6877_p6), %s3708_s0, 144  }
 0xa0e   : > { %5715 = vsyncadd (!%p6877_p6), %s3708_s0, 4294967152  ;;  %s3725_s11 = scalar_lea.sflag [#allocation36], %s3662_s13 }
 0xa0f   : > { %5717 = dma.done.wait (!%p6877_p6), %s3725_s11, 16  }
 0xa10   : > { %5719 = vsyncadd (!%p6877_p6), %s3725_s11, 4294967280  ;;  %s7137_s11 = sld [smem:[#allocation94_spill]]  ;;  %s7138_s9 = sld [smem:[#allocation93_spill]] }
 0xa11   : > { %s7139_s10 = sld [smem:[#allocation95_spill]]  ;;  %s7140_s0 = smov %s5726_s7 }
 0xa16   : > { %p126_p0 = scmp.ge.s32.totalorder %s7137_s11, 4   ;;  %s7141_s7 = smov %s7138_s9 }
 0xa18   :  { %128 = sbr.rel (!%p126_p0) target bundleno = 117 (0x75), region = 446 }
 0xa1f   :  { %3729 = vsyncpa [#allocation3], 1 }
 0xa20   :  { %3731 = vsyncpa [#allocation3 + $0x1], 1 }
 0xa21   :  { %3732 = vsyncpa [#allocation6], 1 }
 0xa22   :  { %3734 = vsyncpa [#allocation6 + $0x1], 1 }
 0xa23   :  { %3735 = vsyncpa [#allocation9], 1 }
 0xa24   :  { %3736 = vsyncpa [#allocation12], 1 }
 0xa25   :  { %3737 = vsyncpa [#allocation15], 1 }
 0xa26   :  { %3738 = vsyncpa [#allocation18], 1 }
 0xa27   :  { %3739 = vsyncpa [#allocation21], 1 }
 0xa28   :  { %3740 = vsyncpa [#allocation24], 1 }
 0xa29   :  { %3741 = vsyncpa [#allocation4], 1 }
 0xa2a   :  { %3743 = vsyncpa [#allocation4 + $0x1], 1 }
 0xa2b   :  { %3744 = vsyncpa [#allocation27], 1 }
 0xa2c   :  { %3746 = vsyncpa [#allocation27 + $0x1], 1 }
 0xa2d   :  { %3747 = vsyncpa [#allocation30], 1 }
 0xa2e   :  { %3749 = vsyncpa [#allocation30 + $0x1], 1 }
 0xa2f   :  { %3750 = vsyncpa [#allocation33], 1 }
 0xa30   :  { %3752 = vsyncpa [#allocation33 + $0x1], 1 }
 0xa31   :  { %3753 = vsyncpa [#allocation36], 1 }
 0xa32   :  { %3755 = vsyncpa [#allocation36 + $0x1], 1 }

</bundles_post_ra>
